<compile_context>
chip_gen: v7x
topology: tpu7x:2x2x1
jax: 0.10.0
libtpu: 0.0.40
codegen_flags: <defaults>
</compile_context>

<pallas_src>
import jax
import jax.numpy as jnp
from jax.experimental import pallas as pl
from jax.experimental.pallas import tpu as pltpu

H1, H2, H3, H_OUT = 1024, 512, 256, 1  # hidden sizes fixed by the module


def _round_up(n, m):
    return ((n + m - 1) // m) * m


def mlp_kernel(x_ref,
               w1_ref, b1_ref,
               w2_ref, b2_ref,
               w3_ref, b3_ref,
               w4_ref, b4_ref,
               o_ref):
    """Fused 4-layer MLP forward for one batch tile (all weights VMEM-resident)."""
    # x arrives straight from HBM as f32; cast to bf16 on the VPU (free under MXU slack).
    x = x_ref[...].astype(jnp.bfloat16)                               # [TB, F]
    h = jnp.dot(x, w1_ref[...], preferred_element_type=jnp.float32)   # [TB, 1024] f32 acc
    h = jnp.maximum(h + b1_ref[...], 0.0)                             # bias + ReLU in f32
    # Dropout(0.3): identity at inference time.
    # TODO(synk): training-mode dropout would need pltpu.prng_seed / prng_random_bits masking.
    h = jnp.dot(h.astype(jnp.bfloat16), w2_ref[...],
                preferred_element_type=jnp.float32)                    # [TB, 512]
    h = jnp.maximum(h + b2_ref[...], 0.0)
    h = jnp.dot(h.astype(jnp.bfloat16), w3_ref[...],
                preferred_element_type=jnp.float32)                    # [TB, 256]
    h = jnp.maximum(h + b3_ref[...], 0.0)
    # Final 256->1 layer: VPU multiply + XLU lane reduction against the [1, 256] weight
    # row (rides separate VLIW slots; no degenerate [TB,256]@[256,1] MXU matmul).
    logits = jnp.sum(h * w4_ref[...], axis=-1, keepdims=True) + b4_ref[...]   # [TB, 1]
    # Lane-dense store: one (1, TB) row per grid step (no masked width-1 stores).
    o_ref[...] = logits.reshape(1, -1).astype(o_ref.dtype)


def draft_win_predictor(x, params, *, tile_b=512):
    """x: [B, F] float32.  params from init_params.  Returns [B, 1] float32."""
    B, F = x.shape

    # Batch tile: multiple of 8 (sublanes), at most tile_b.  No wrapper-side padding
    # or bf16 cast of x: the grid uses cdiv and Pallas clamps the ragged last block
    # (out-of-range rows are garbage that never touches valid rows and is sliced off).
    tb = min(tile_b, _round_up(B, 8))
    num_tiles = pl.cdiv(B, tb)

    w1, b1 = params["w1"], params["b1"]
    w2, b2 = params["w2"], params["b2"]
    w3, b3 = params["w3"], params["b3"]
    w4, b4 = params["w4_row"], params["b4"]

    def resident(shape):
        # Constant index_map + single buffer: fetched once, stays resident in VMEM.
        return pl.BlockSpec(shape, lambda i: (0, 0), pipeline_mode=pl.Buffered(1))

    out = pl.pallas_call(
        mlp_kernel,
        # Lane-dense output layout: one row of width tb per grid step.
        out_shape=jax.ShapeDtypeStruct((num_tiles, tb), jnp.float32),
        grid_spec=pltpu.PrefetchScalarGridSpec(
            num_scalar_prefetch=0,
            grid=(num_tiles,),
            in_specs=[
                pl.BlockSpec((tb, F), lambda i: (i, 0)),   # x batch tile, f32 in HBM
                resident(w1.shape), resident(b1.shape),
                resident(w2.shape), resident(b2.shape),
                resident(w3.shape), resident(b3.shape),
                resident(w4.shape), resident(b4.shape),
            ],
            out_specs=pl.BlockSpec((1, tb), lambda i: (i, 0)),
        ),
        compiler_params=pltpu.CompilerParams(
            dimension_semantics=("parallel",),
            # tb=512 intermediates are ~7 MiB + ~1.3 MiB resident weights; 32 MiB
            # covers v5e/v6e/v7x comfortably.  Raise this (and re-check v7x's 64 MiB
            # physical VMEM per core) before pushing tile_b to 1024.
            vmem_limit_bytes=32 * 1024 * 1024,
        ),
    )(x, w1, b1, w2, b2, w3, b3, w4, b4)
    # Flat element j of `out` is the prediction for input row j; slice off ragged tail.
    return out.reshape(-1)[:B].reshape(B, 1)


def init_params(key, input_size):
    """Deterministic synthetic init (nn.Linear shapes, stored [in, out]).

    w1..w3 are kept in bf16 (weight HBM bandwidth dominates at small batch);
    biases and the tiny final layer stay f32.
    """
    # TODO(synk): for small-batch serving, fp8 (v7x) / int8 (v5e/v6e) weight storage
    # would roughly halve the dominant w2 HBM stream; needs accuracy validation.
    ks = jax.random.split(key, 8)

    def lin(kw, kb, fan_in, fan_out, w_dtype):
        w = (jax.random.normal(kw, (fan_in, fan_out), jnp.float32)
             * (1.0 / jnp.sqrt(fan_in))).astype(w_dtype)
        b = jax.random.normal(kb, (1, fan_out), jnp.float32) * 0.01
        return w, b

    w1, b1 = lin(ks[0], ks[1], input_size, H1, jnp.bfloat16)
    w2, b2 = lin(ks[2], ks[3], H1, H2, jnp.bfloat16)
    w3, b3 = lin(ks[4], ks[5], H2, H3, jnp.bfloat16)
    w4, b4 = lin(ks[6], ks[7], H3, H_OUT, jnp.float32)
    # Final layer stored as a [1, 256] row so the kernel can do a lane reduction.
    w4_row = w4.reshape(1, H3)
    return dict(w1=w1, b1=b1, w2=w2, b2=b2, w3=w3, b3=b3, w4_row=w4_row, b4=b4)


def reference_forward(x, p):
    """Pure-JAX reference following the same bf16-storage / f32-accumulation path."""
    h = jnp.dot(x.astype(jnp.bfloat16), p["w1"], preferred_element_type=jnp.float32)
    h = jnp.maximum(h + p["b1"], 0.0)
    h = jnp.dot(h.astype(jnp.bfloat16), p["w2"], preferred_element_type=jnp.float32)
    h = jnp.maximum(h + p["b2"], 0.0)
    h = jnp.dot(h.astype(jnp.bfloat16), p["w3"], preferred_element_type=jnp.float32)
    h = jnp.maximum(h + p["b3"], 0.0)
    return jnp.sum(h * p["w4_row"], axis=-1, keepdims=True) + p["b4"]


if __name__ == "__main__":
    key = jax.random.PRNGKey(0)
    k_x, k_p = jax.random.split(key)

    B, input_size = 16, 32          # small batch of draft feature vectors
    x = jax.random.normal(k_x, (B, input_size), jnp.float32)
    params = init_params(k_p, input_size)

    out = jax.block_until_ready(draft_win_predictor(x, params))
    ref = reference_forward(x, params)

    assert out.shape == (B, 1), out.shape
    assert jnp.allclose(out, ref, atol=2e-3, rtol=2e-3), "mismatch vs JAX reference"

    print("KERNEL_OK")
</pallas_src>

<mosaic_0001>
module attributes {stable_mosaic.version = 11 : i64} {
  func.func @mlp_kernel(%arg0: i32, %arg1: memref<16x32xf32, #tpu.memory_space<vmem>>, %arg2: memref<32x1024xbf16, #tpu.memory_space<vmem>>, %arg3: memref<1x1024xf32, #tpu.memory_space<vmem>>, %arg4: memref<1024x512xbf16, #tpu.memory_space<vmem>>, %arg5: memref<1x512xf32, #tpu.memory_space<vmem>>, %arg6: memref<512x256xbf16, #tpu.memory_space<vmem>>, %arg7: memref<1x256xf32, #tpu.memory_space<vmem>>, %arg8: memref<1x256xf32, #tpu.memory_space<vmem>>, %arg9: memref<1x1xf32, #tpu.memory_space<vmem>>, %arg10: memref<1x16xf32, #tpu.memory_space<vmem>>) attributes {dimension_semantics = [#tpu.dimension_semantics<parallel>], iteration_bounds = array<i64: 1>, scalar_prefetch = 0 : i64, scratch_operands = 0 : i64, tpu.core_type = #tpu.core_type<tc>, window_params = [{transform_indices = @transform_0, window_bounds = array<i64: 16, 32>}, {pipeline_mode = #tpu.pipeline_mode<synchronous>, transform_indices = @transform_1, window_bounds = array<i64: 32, 1024>}, {pipeline_mode = #tpu.pipeline_mode<synchronous>, transform_indices = @transform_2, window_bounds = array<i64: 1, 1024>}, {pipeline_mode = #tpu.pipeline_mode<synchronous>, transform_indices = @transform_3, window_bounds = array<i64: 1024, 512>}, {pipeline_mode = #tpu.pipeline_mode<synchronous>, transform_indices = @transform_4, window_bounds = array<i64: 1, 512>}, {pipeline_mode = #tpu.pipeline_mode<synchronous>, transform_indices = @transform_5, window_bounds = array<i64: 512, 256>}, {pipeline_mode = #tpu.pipeline_mode<synchronous>, transform_indices = @transform_6, window_bounds = array<i64: 1, 256>}, {pipeline_mode = #tpu.pipeline_mode<synchronous>, transform_indices = @transform_7, window_bounds = array<i64: 1, 256>}, {pipeline_mode = #tpu.pipeline_mode<synchronous>, transform_indices = @transform_8, window_bounds = array<i64: 1, 1>}, {transform_indices = @transform_9, window_bounds = array<i64: 1, 16>}]} {
    %c0 = arith.constant 0 : index
    %c0_0 = arith.constant 0 : index
    %0 = vector.load %arg1[%c0, %c0_0] : memref<16x32xf32, #tpu.memory_space<vmem>>, vector<16x32xf32>
    %1 = arith.truncf %0 : vector<16x32xf32> to vector<16x32xbf16>
    %c0_1 = arith.constant 0 : index
    %c0_2 = arith.constant 0 : index
    %2 = vector.load %arg2[%c0_1, %c0_2] : memref<32x1024xbf16, #tpu.memory_space<vmem>>, vector<32x1024xbf16>
    %cst = arith.constant dense<0.000000e+00> : vector<16x1024xf32>
    %3 = tpu.matmul %1, %2, %cst {dimension_numbers = #tpu.dot_dimension_numbers<[1], [0], [0], [1], [0, 0, 1, 1], [], []>} : vector<16x32xbf16>, vector<32x1024xbf16>, vector<16x1024xf32> -> vector<16x1024xf32>
    %c0_3 = arith.constant 0 : index
    %c0_4 = arith.constant 0 : index
    %4 = vector.load %arg3[%c0_3, %c0_4] : memref<1x1024xf32, #tpu.memory_space<vmem>>, vector<1x1024xf32>
    %5 = vector.broadcast %4 : vector<1x1024xf32> to vector<16x1024xf32>
    %6 = arith.addf %3, %5 : vector<16x1024xf32>
    %cst_5 = arith.constant 0.000000e+00 : f32
    %7 = vector.broadcast %cst_5 : f32 to vector<16x1024xf32>
    %8 = arith.maximumf %6, %7 : vector<16x1024xf32>
    %9 = arith.truncf %8 : vector<16x1024xf32> to vector<16x1024xbf16>
    %c0_6 = arith.constant 0 : index
    %c0_7 = arith.constant 0 : index
    %10 = vector.load %arg4[%c0_6, %c0_7] : memref<1024x512xbf16, #tpu.memory_space<vmem>>, vector<1024x512xbf16>
    %cst_8 = arith.constant dense<0.000000e+00> : vector<16x512xf32>
    %11 = tpu.matmul %9, %10, %cst_8 {dimension_numbers = #tpu.dot_dimension_numbers<[1], [0], [0], [1], [0, 0, 1, 1], [], []>} : vector<16x1024xbf16>, vector<1024x512xbf16>, vector<16x512xf32> -> vector<16x512xf32>
    %c0_9 = arith.constant 0 : index
    %c0_10 = arith.constant 0 : index
    %12 = vector.load %arg5[%c0_9, %c0_10] : memref<1x512xf32, #tpu.memory_space<vmem>>, vector<1x512xf32>
    %13 = vector.broadcast %12 : vector<1x512xf32> to vector<16x512xf32>
    %14 = arith.addf %11, %13 : vector<16x512xf32>
    %cst_11 = arith.constant 0.000000e+00 : f32
    %15 = vector.broadcast %cst_11 : f32 to vector<16x512xf32>
    %16 = arith.maximumf %14, %15 : vector<16x512xf32>
    %17 = arith.truncf %16 : vector<16x512xf32> to vector<16x512xbf16>
    %c0_12 = arith.constant 0 : index
    %c0_13 = arith.constant 0 : index
    %18 = vector.load %arg6[%c0_12, %c0_13] : memref<512x256xbf16, #tpu.memory_space<vmem>>, vector<512x256xbf16>
    %cst_14 = arith.constant dense<0.000000e+00> : vector<16x256xf32>
    %19 = tpu.matmul %17, %18, %cst_14 {dimension_numbers = #tpu.dot_dimension_numbers<[1], [0], [0], [1], [0, 0, 1, 1], [], []>} : vector<16x512xbf16>, vector<512x256xbf16>, vector<16x256xf32> -> vector<16x256xf32>
    %c0_15 = arith.constant 0 : index
    %c0_16 = arith.constant 0 : index
    %20 = vector.load %arg7[%c0_15, %c0_16] : memref<1x256xf32, #tpu.memory_space<vmem>>, vector<1x256xf32>
    %21 = vector.broadcast %20 : vector<1x256xf32> to vector<16x256xf32>
    %22 = arith.addf %19, %21 : vector<16x256xf32>
    %cst_17 = arith.constant 0.000000e+00 : f32
    %23 = vector.broadcast %cst_17 : f32 to vector<16x256xf32>
    %24 = arith.maximumf %22, %23 : vector<16x256xf32>
    %c0_18 = arith.constant 0 : index
    %c0_19 = arith.constant 0 : index
    %25 = vector.load %arg8[%c0_18, %c0_19] : memref<1x256xf32, #tpu.memory_space<vmem>>, vector<1x256xf32>
    %26 = vector.broadcast %25 : vector<1x256xf32> to vector<16x256xf32>
    %27 = arith.mulf %24, %26 : vector<16x256xf32>
    %cst_20 = arith.constant dense<0.000000e+00> : vector<16xf32>
    %28 = vector.multi_reduction <add>, %27, %cst_20 [1] : vector<16x256xf32> to vector<16xf32>
    %29 = vector.shape_cast %28 : vector<16xf32> to vector<16x1xf32>
    %c0_21 = arith.constant 0 : index
    %c0_22 = arith.constant 0 : index
    %30 = vector.load %arg9[%c0_21, %c0_22] : memref<1x1xf32, #tpu.memory_space<vmem>>, vector<1x1xf32>
    %31 = vector.broadcast %30 : vector<1x1xf32> to vector<16x1xf32>
    %32 = arith.addf %29, %31 : vector<16x1xf32>
    %33 = vector.shape_cast %32 : vector<16x1xf32> to vector<1x16xf32>
    %c0_23 = arith.constant 0 : index
    %c0_24 = arith.constant 0 : index
    %34 = vector.load %arg10[%c0_23, %c0_24] : memref<1x16xf32, #tpu.memory_space<vmem>>, vector<1x16xf32>
    tpu.vector_store %arg10[%c0_23, %c0_24], %33 {strides = array<i32>} : memref<1x16xf32, #tpu.memory_space<vmem>>, vector<1x16xf32>,
    return
  }
  func.func @transform_0(%arg0: i32) -> (i32, i32) {
    %c0_i32 = arith.constant 0 : i32
    %c0_i32_0 = arith.constant 0 : i32
    return %arg0, %c0_i32 : i32, i32
  }
  func.func @transform_1(%arg0: i32) -> (i32, i32) {
    %c0_i32 = arith.constant 0 : i32
    %c0_i32_0 = arith.constant 0 : i32
    %c0_i32_1 = arith.constant 0 : i32
    return %c0_i32, %c0_i32_0 : i32, i32
  }
  func.func @transform_2(%arg0: i32) -> (i32, i32) {
    %c0_i32 = arith.constant 0 : i32
    %c0_i32_0 = arith.constant 0 : i32
    %c0_i32_1 = arith.constant 0 : i32
    return %c0_i32, %c0_i32_0 : i32, i32
  }
  func.func @transform_3(%arg0: i32) -> (i32, i32) {
    %c0_i32 = arith.constant 0 : i32
    %c0_i32_0 = arith.constant 0 : i32
    %c0_i32_1 = arith.constant 0 : i32
    return %c0_i32, %c0_i32_0 : i32, i32
  }
  func.func @transform_4(%arg0: i32) -> (i32, i32) {
    %c0_i32 = arith.constant 0 : i32
    %c0_i32_0 = arith.constant 0 : i32
    %c0_i32_1 = arith.constant 0 : i32
    return %c0_i32, %c0_i32_0 : i32, i32
  }
  func.func @transform_5(%arg0: i32) -> (i32, i32) {
    %c0_i32 = arith.constant 0 : i32
    %c0_i32_0 = arith.constant 0 : i32
    %c0_i32_1 = arith.constant 0 : i32
    return %c0_i32, %c0_i32_0 : i32, i32
  }
  func.func @transform_6(%arg0: i32) -> (i32, i32) {
    %c0_i32 = arith.constant 0 : i32
    %c0_i32_0 = arith.constant 0 : i32
    %c0_i32_1 = arith.constant 0 : i32
    return %c0_i32, %c0_i32_0 : i32, i32
  }
  func.func @transform_7(%arg0: i32) -> (i32, i32) {
    %c0_i32 = arith.constant 0 : i32
    %c0_i32_0 = arith.constant 0 : i32
    %c0_i32_1 = arith.constant 0 : i32
    return %c0_i32, %c0_i32_0 : i32, i32
  }
  func.func @transform_8(%arg0: i32) -> (i32, i32) {
    %c0_i32 = arith.constant 0 : i32
    %c0_i32_0 = arith.constant 0 : i32
    %c0_i32_1 = arith.constant 0 : i32
    return %c0_i32, %c0_i32_0 : i32, i32
  }
  func.func @transform_9(%arg0: i32) -> (i32, i32) {
    %c0_i32 = arith.constant 0 : i32
    %c0_i32_0 = arith.constant 0 : i32
    return %arg0, %c0_i32 : i32, i32
  }
}

</mosaic_0001>

<bundles_post_ra>
// kernel: tpu_custom_call.1
= control target key start
LH: loop header
LB: loop body
LE: loop exit
PB: predicated region body
PF: predicated region fallthrough
CT: control target
= control target key end

     0   :  { %s4112_s0 = inlined_call_operand.hbm [shape: f32[16,32], index: 0, kind: input, shape index: {}]   ;;  %s4113_s1 = inlined_call_operand.hbm [shape: bf16[32,1024], index: 1, kind: input, shape index: {}]   ;;  %s4114_s2 = inlined_call_operand.vmem [shape: f32[1,1024], index: 2, kind: input, shape index: {}]   ;;  %s4115_s3 = inlined_call_operand.hbm [shape: bf16[1024,512], index: 3, kind: input, shape index: {}]   ;;  %s4116_s4 = inlined_call_operand.vmem [shape: f32[1,512], index: 4, kind: input, shape index: {}]   ;;  %s4117_s5 = inlined_call_operand.hbm [shape: bf16[512,256], index: 5, kind: input, shape index: {}]   ;;  %s4118_s6 = inlined_call_operand.vmem [shape: f32[1,256], index: 6, kind: input, shape index: {}]   ;;  %s4119_s7 = inlined_call_operand.vmem [shape: f32[1,256], index: 7, kind: input, shape index: {}]   ;;  %s4120_s8 = inlined_call_operand.<no memory space> [shape: f32[1,1], index: 8, kind: input, shape index: {}]   ;;  %s4121_s9 = inlined_call_operand.hbm [shape: f32[1,16], index: 9, kind: output, shape index: {}]  }
   0x1   :  { %v14_v0 = vstv %s4120_s8 }
   0x2   :  { %15 = vst [vmem:[#allocation2] sm:$0x1] %v14_v0 }
   0x3   :  { %16 = vsyncpa [#allocation4], 0 }
   0x4   :  { %17 = vsyncpa [#allocation7], 0 }
   0x5   :  { %18 = vsyncpa [#allocation10], 0 }
   0x6   :  { %19 = vsyncpa [#allocation5], 0  ;;  %s3897_s11 = smov [#allocation6]   ;;  %s3779_s15 = scalar_lea.hbm %s4113_s1, 2048 }
   0x7   :  { %s37_s12 = sshll.u32 %s3897_s11, 4  ;;  %p3780_p0 = scmp.ne.s32.totalorder %s4113_s1, %s3779_s15  ;;  %s38_s12 = int_to_ptr.vmem [resolvable:$true] %s37_s12 }
   0x8   :  { %p3783_p1 = scmp.lt.u32.totalorder %s3779_s15, %s4113_s1 }
   0xa   :  { %p3785_p2 = pnand %p3783_p1, %p3780_p0 }
   0xc   :  { %3788 = shalt.err (!%p3785_p2)
}
   0xd   :  { %s3789_s8 = scalar_lea.vmem %s38_s12, 2048  ;;  %p3794_p4 = scmp.lt.s32.totalorder %s38_s12, %s38_s12 }
   0xe   :  { %p3790_p3 = scmp.ne.s32.totalorder %s38_s12, %s3789_s8  ;;  %p3795_p5 = scmp.lt.s32.totalorder %s3789_s8, %s3789_s8 }
  0x10   :  { %p3796_p6 = por %p3795_p5, %p3794_p4 }
  0x12   :  { %p3797_p7 = pnand %p3796_p6, %p3790_p3 }
  0x14   :  { %3800 = shalt.err (!%p3797_p7)
}
  0x15   :  { %s3898_s20 = smov 512   ;;  %s3899_s21 = smov 32  }
  0x16   :  { %43 = dma.hbm_to_vmem [thread:$0]  %s4113_s1, 2048, %s38_s12, [#allocation7], %s3898_s20, %s3898_s20, %s3899_s21  }
  0x17   :  { %s3900_s24 = smov [#allocation3]   ;;  %s3801_s28 = scalar_lea.hbm %s4112_s0, 256 }
  0x18   :  { %s25_s25 = sshll.u32 %s3900_s24, 4  ;;  %p3802_p8 = scmp.ne.s32.totalorder %s4112_s0, %s3801_s28  ;;  %s26_s25 = int_to_ptr.vmem [resolvable:$true] %s25_s25 }
  0x19   :  { %p3805_p9 = scmp.lt.u32.totalorder %s3801_s28, %s4112_s0 }
  0x1b   :  { %p3807_p10 = pnand %p3805_p9, %p3802_p8 }
  0x1d   :  { %3810 = shalt.err (!%p3807_p10)
}
  0x1e   :  { %s3811_s13 = scalar_lea.vmem %s26_s25, 256  ;;  %p3816_p12 = scmp.lt.s32.totalorder %s26_s25, %s26_s25 }
  0x1f   :  { %p3812_p11 = scmp.ne.s32.totalorder %s26_s25, %s3811_s13  ;;  %p3817_p13 = scmp.lt.s32.totalorder %s3811_s13, %s3811_s13 }
  0x21   :  { %p3818_p0 = por %p3817_p13, %p3816_p12 }
  0x23   :  { %p3819_p1 = pnand %p3818_p0, %p3812_p11 }
  0x25   :  { %3822 = shalt.err (!%p3819_p1)
}
  0x26   :  { %s3901_s1 = smov 128   ;;  %s3902_s12 = smov 8  }
  0x27   :  { %31 = dma.hbm_to_vmem [thread:$0]  %s4112_s0, 256, %s26_s25, [#allocation4], %s3901_s1, %s3901_s1, %s3902_s12  }
  0x28   :  { %s3903_s16 = smov [#allocation8]   ;;  %s3823_s8 = scalar_lea.hbm %s4115_s3, 32768 }
  0x29   :  { %s51_s17 = sshll.u32 %s3903_s16, 4  ;;  %p3824_p2 = scmp.ne.s32.totalorder %s4115_s3, %s3823_s8  ;;  %s52_s17 = int_to_ptr.vmem [resolvable:$true] %s51_s17 }
  0x2a   :  { %p3827_p3 = scmp.lt.u32.totalorder %s3823_s8, %s4115_s3 }
  0x2c   :  { %p3829_p4 = pnand %p3827_p3, %p3824_p2 }
  0x2e   :  { %3832 = shalt.err (!%p3829_p4)
}
  0x2f   :  { %s3833_s24 = scalar_lea.vmem %s52_s17, 32768  ;;  %p3838_p6 = scmp.lt.s32.totalorder %s52_s17, %s52_s17 }
  0x30   :  { %p3834_p5 = scmp.ne.s32.totalorder %s52_s17, %s3833_s24  ;;  %p3839_p7 = scmp.lt.s32.totalorder %s3833_s24, %s3833_s24 }
  0x32   :  { %p3840_p8 = por %p3839_p7, %p3838_p6 }
  0x34   :  { %p3841_p9 = pnand %p3840_p8, %p3834_p5 }
  0x36   :  { %3844 = shalt.err (!%p3841_p9)
}
  0x37   :  { %s3904_s0 = smov 256   ;;  %s3905_s25 = smov 16  }
  0x38   :  { %57 = dma.hbm_to_vmem [thread:$0]  %s4115_s3, 32768, %s52_s17, [#allocation7], %s3904_s0, %s3904_s0, %s3905_s25  }
  0x39   :  { %s3906_s28 = smov [#allocation9]   ;;  %s3845_s11 = scalar_lea.hbm %s4117_s5, 8192 }
  0x3a   :  { %s65_s29 = sshll.u32 %s3906_s28, 4  ;;  %p3846_p10 = scmp.ne.s32.totalorder %s4117_s5, %s3845_s11  ;;  %s66_s29 = int_to_ptr.vmem [resolvable:$true] %s65_s29 }
  0x3b   :  { %p3849_p11 = scmp.lt.u32.totalorder %s3845_s11, %s4117_s5 }
  0x3d   :  { %p3851_p12 = pnand %p3849_p11, %p3846_p10 }
  0x3f   :  { %3854 = shalt.err (!%p3851_p12)
}
  0x40   :  { %s3855_s18 = scalar_lea.vmem %s66_s29, 8192  ;;  %p3860_p0 = scmp.lt.s32.totalorder %s66_s29, %s66_s29 }
  0x41   :  { %p3856_p13 = scmp.ne.s32.totalorder %s66_s29, %s3855_s18  ;;  %p3861_p1 = scmp.lt.s32.totalorder %s3855_s18, %s3855_s18 }
  0x43   :  { %p3862_p2 = por %p3861_p1, %p3860_p0 }
  0x45   :  { %p3863_p3 = pnand %p3862_p2, %p3856_p13 }
  0x47   :  { %3866 = shalt.err (!%p3863_p3)
}
  0x48   :  { %71 = dma.hbm_to_vmem [thread:$0]  %s4117_s5, 8192, %s66_s29, [#allocation10], %s3901_s1, %s3901_s1, %s3902_s12  }
  0x49   :  { %3889 = dma.done.wait [#allocation4], 256  }
  0x4a   :  { %3890 = vsyncadd [#allocation4], 4294967040 }
  0x4b   :  { %3891 = dma.done.wait [#allocation7], 34816  }
  0x4c   :  { %3892 = vsyncadd [#allocation7], 4294932480 }
  0x4d   :  { %3893 = dma.done.wait [#allocation10], 8192  }
  0x4e   :  { %3894 = vsyncadd [#allocation10], 4294959104  ;;  %v3907_v1 = vmov 0   ;;  %v94_v2 = vld [vmem:[#allocation6] sm:$0xff]  ;;  %v95_v4 = vld [vmem:[#allocation6 + $0x8] sm:$0xff]  ;;  %vm232_vm0 = vcmask 261120  }
  0x4f   :  { %268 = vmatprep.mubr.bf16.mxu0 %v3907_v1  ;;  %311 = vmatprep.mubr.bf16.mxu1 %v3907_v1  ;;  %v98_v3 = vld [vmem:[#allocation6 + $0x20] sm:$0xff]  ;;  %v99_v6 = vld [vmem:[#allocation6 + $0x28] sm:$0xff]  ;;  %v96_v16 = vld [vmem:[#allocation6 + $0x10] sm:$0xff]  ;;  %vm2882_vm1 = vcmask 130112   ;;  %vm2885_vm2 = vcmask 122880  }
  0x50   :  { %3297 = vset.pattern.permute.xlu1 %v3907_v1  ;;  %3298 = vset.pattern.permute.xlu0 %v3907_v1  ;;  %v2905_v5 = vcombine.high %v94_v2, %v98_v3  ;;  %v2904_v7 = vcombine.low %v94_v2, %v98_v3  ;;  %v102_v8 = vld [vmem:[#allocation6 + $0x40] sm:$0xff]  ;;  %v2907_v10 = vcombine.high %v95_v4, %v99_v6  ;;  %v103_v13 = vld [vmem:[#allocation6 + $0x48] sm:$0xff]  ;;  %v100_v17 = vld [vmem:[#allocation6 + $0x30] sm:$0xff] }
  0x51   :  { %v106_v9 = vld [vmem:[#allocation6 + $0x60] sm:$0xff]  ;;  %v2906_v11 = vcombine.low %v95_v4, %v99_v6  ;;  %v107_v14 = vld [vmem:[#allocation6 + $0x68] sm:$0xff]  ;;  %v91_v19 = vld [vmem:[#allocation3] sm:$0xff]  ;;  %v2909_v23 = vcombine.high %v96_v16, %v100_v17  ;;  %v2908_v29 = vcombine.low %v96_v16, %v100_v17 }
  0x52   :  { %v2913_v12 = vcombine.high %v102_v8, %v106_v9  ;;  %236 = vmatprep.subr.bf16.mxu0 %v2905_v5  ;;  %v2915_v15 = vcombine.high %v103_v13, %v107_v14  ;;  %279 = vmatprep.subr.bf16.mxu1 %v2907_v10  ;;  %v2912_v18 = vcombine.low %v102_v8, %v106_v9  ;;  %v92_v20 = vld [vmem:[#allocation3 + $0x8] sm:$0xff]  ;;  %v104_v24 = vld [vmem:[#allocation6 + $0x50] sm:$0xff] }
  0x53   :  { %237 = vmatpush1.bf16.msra.mxu0 %v2904_v7  ;;  %v97_v21 = vld [vmem:[#allocation6 + $0x18] sm:$0xff]  ;;  %280 = vmatpush1.bf16.msra.mxu1 %v2906_v11  ;;  %v2914_v22 = vcombine.low %v103_v13, %v107_v14  ;;  %v108_v26 = vld [vmem:[#allocation6 + $0x70] sm:$0xff]  ;;  %v93_v28 = vpack.c.bf16 %v92_v20, %v91_v19 }
  0x54   :  { %238 = vmatprep.subr.bf16.mxu0 %v2913_v12  ;;  %v101_v25 = vld [vmem:[#allocation6 + $0x38] sm:$0xff]  ;;  %281 = vmatprep.subr.bf16.mxu1 %v2915_v15  ;;  %v2917_v32 = vcombine.high %v104_v24, %v108_v26  ;;  %v2916_v35 = vcombine.low %v104_v24, %v108_v26  ;;  %v3304_v36 = vld [vmem:[#allocation8 + $0x204] ss:$16 sps:$4 sm:$0xff]   ;;  %v3302_v39 = vld [vmem:[#allocation8 + $0x200] ss:$16 sps:$4 sm:$0xff]  }
  0x55   :  { %v2911_v27 = vcombine.high %v97_v21, %v101_v25  ;;  %v105_v30 = vld [vmem:[#allocation6 + $0x58] sm:$0xff]  ;;  %v2910_v33 = vcombine.low %v97_v21, %v101_v25  ;;  %v3301_v38 = vld [vmem:[#allocation8 + $0x4] ss:$16 sps:$4 sm:$0xff]   ;;  %v3299_v41 = vld [vmem:[#allocation8] ss:$16 sps:$4 sm:$0xff]  }
  0x56   :  { %v109_v31 = vld [vmem:[#allocation6 + $0x78] sm:$0xff]  ;;  %v3310_v40 = vld [vmem:[#allocation8 + $0x224] ss:$16 sps:$4 sm:$0xff]   ;;  %v3308_v43 = vld [vmem:[#allocation8 + $0x220] ss:$16 sps:$4 sm:$0xff]  }
  0x57   :  { %239 = vmatpush1.bf16.msra.mxu0 %v2912_v18  ;;  %282 = vmatpush1.bf16.msra.mxu1 %v2914_v22  ;;  %v2919_v34 = vcombine.high %v105_v30, %v109_v31  ;;  %v2918_v37 = vcombine.low %v105_v30, %v109_v31  ;;  %v3307_v42 = vld [vmem:[#allocation8 + $0x24] ss:$16 sps:$4 sm:$0xff]   ;;  %v3305_v45 = vld [vmem:[#allocation8 + $0x20] ss:$16 sps:$4 sm:$0xff]  }
  0x58   :  { %322 = vmatprep.subr.bf16.mxu0 %v2909_v23  ;;  %365 = vmatprep.subr.bf16.mxu1 %v2911_v27  ;;  %v3316_v44 = vld [vmem:[#allocation8 + $0x244] ss:$16 sps:$4 sm:$0xff]   ;;  %v3314_v47 = vld [vmem:[#allocation8 + $0x240] ss:$16 sps:$4 sm:$0xff]  }
  0x59   :  { %v3313_v46 = vld [vmem:[#allocation8 + $0x44] ss:$16 sps:$4 sm:$0xff]   ;;  %v3311_v49 = vld [vmem:[#allocation8 + $0x40] ss:$16 sps:$4 sm:$0xff]  }
  0x5a   :  { %2920 = vmatmul.mubr.msk.bf16.vlgmr.msra.gmra.mrb[0].mxu0 %vm232_vm0, %v93_v28  ;;  %2921 = vmatmul.mubr.msk.bf16.vlgmr.msra.gmra.mrb[0].mxu1 %vm232_vm0, %v93_v28  ;;  %v3322_v48 = vld [vmem:[#allocation8 + $0x264] ss:$16 sps:$4 sm:$0xff]   ;;  %v3320_v51 = vld [vmem:[#allocation8 + $0x260] ss:$16 sps:$4 sm:$0xff]  }
  0x5b   :  { %323 = vmatpush1.bf16.msra.mxu0 %v2908_v29  ;;  %354 = vmatprep.mubr.bf16.mxu0 %v3907_v1  ;;  %v3319_v50 = vld [vmem:[#allocation8 + $0x64] ss:$16 sps:$4 sm:$0xff]   ;;  %v3317_v53 = vld [vmem:[#allocation8 + $0x60] ss:$16 sps:$4 sm:$0xff]  }
  0x5c   :  { %324 = vmatprep.subr.bf16.mxu0 %v2917_v32  ;;  %366 = vmatpush1.bf16.msra.mxu1 %v2910_v33  ;;  %v3328_v52 = vld [vmem:[#allocation8 + $0x284] ss:$16 sps:$4 sm:$0xff]   ;;  %v3326_v55 = vld [vmem:[#allocation8 + $0x280] ss:$16 sps:$4 sm:$0xff]  }
  0x5d   :  { %397 = vmatprep.mubr.bf16.mxu1 %v3907_v1  ;;  %367 = vmatprep.subr.bf16.mxu1 %v2919_v34  ;;  %v3325_v54 = vld [vmem:[#allocation8 + $0x84] ss:$16 sps:$4 sm:$0xff]   ;;  %v3323_v57 = vld [vmem:[#allocation8 + $0x80] ss:$16 sps:$4 sm:$0xff]  }
  0x5e   :  { %v3334_v56 = vld [vmem:[#allocation8 + $0x2a4] ss:$16 sps:$4 sm:$0xff]   ;;  %v3332_v59 = vld [vmem:[#allocation8 + $0x2a0] ss:$16 sps:$4 sm:$0xff]  }
  0x5f   :  { %325 = vmatpush1.bf16.msra.mxu0 %v2916_v35  ;;  %v3331_v58 = vld [vmem:[#allocation8 + $0xa4] ss:$16 sps:$4 sm:$0xff]   ;;  %v3329_v61 = vld [vmem:[#allocation8 + $0xa0] ss:$16 sps:$4 sm:$0xff]  }
  0x60   :  { %2033 = vmatprep.subr.bf16.mxu0 %v3304_v36  ;;  %368 = vmatpush1.bf16.msra.mxu1 %v2918_v37  ;;  %v3340_v60 = vld [vmem:[#allocation8 + $0x2c4] ss:$16 sps:$4 sm:$0xff]   ;;  %v3338_v63 = vld [vmem:[#allocation8 + $0x2c0] ss:$16 sps:$4 sm:$0xff]  }
  0x61   :  { %1990 = vmatprep.subr.bf16.mxu1 %v3301_v38  ;;  %v3337_v62 = vld [vmem:[#allocation8 + $0xc4] ss:$16 sps:$4 sm:$0xff]   ;;  %v3335_v0 = vld [vmem:[#allocation8 + $0xc0] ss:$16 sps:$4 sm:$0xff]   ;;  %v3400_v38 = vld [vmem:[#allocation8 + $0xc] ss:$16 sps:$4 sm:$0xff]  }
  0x62   :  { %2922 = vmatmul.mubr.msk.bf16.vlgmr.msra.gmra.mrb[4].mxu0 %vm232_vm0, %v93_v28  ;;  %v3346_v1 = vld [vmem:[#allocation8 + $0x2e4] ss:$16 sps:$4 sm:$0xff]   ;;  %v3344_v3 = vld [vmem:[#allocation8 + $0x2e0] ss:$16 sps:$4 sm:$0xff]  }
  0x63   :  { %2034 = vmatpush1.bf16.msra.mxu0 %v3302_v39  ;;  %2923 = vmatmul.mubr.msk.bf16.vlgmr.msra.gmra.mrb[4].mxu1 %vm232_vm0, %v93_v28  ;;  %v3343_v2 = vld [vmem:[#allocation8 + $0xe4] ss:$16 sps:$4 sm:$0xff]   ;;  %v3341_v5 = vld [vmem:[#allocation8 + $0xe0] ss:$16 sps:$4 sm:$0xff]   ;;  %v112_v39 = vlaneseq }
  0x64   :  { %2035 = vmatprep.subr.bf16.mxu0 %v3310_v40  ;;  %1991 = vmatpush1.bf16.msra.mxu1 %v3299_v41  ;;  %v3352_v4 = vld [vmem:[#allocation8 + $0x304] ss:$16 sps:$4 sm:$0xff]   ;;  %v3350_v7 = vld [vmem:[#allocation8 + $0x300] ss:$16 sps:$4 sm:$0xff]  }
  0x65   :  { %1992 = vmatprep.subr.bf16.mxu1 %v3307_v42  ;;  %v3349_v6 = vld [vmem:[#allocation8 + $0x104] ss:$16 sps:$4 sm:$0xff]   ;;  %v3347_v9 = vld [vmem:[#allocation8 + $0x100] ss:$16 sps:$4 sm:$0xff]   ;;  %v4021_v40 = vshrl.u32 %v112_v39, 7 }
  0x66   :  { %v3358_v8 = vld [vmem:[#allocation8 + $0x324] ss:$16 sps:$4 sm:$0xff]   ;;  %v3356_v11 = vld [vmem:[#allocation8 + $0x320] ss:$16 sps:$4 sm:$0xff]  }
  0x67   :  { %2036 = vmatpush1.bf16.msra.mxu0 %v3308_v43  ;;  %v3355_v10 = vld [vmem:[#allocation8 + $0x124] ss:$16 sps:$4 sm:$0xff]   ;;  %v3353_v13 = vld [vmem:[#allocation8 + $0x120] ss:$16 sps:$4 sm:$0xff]   ;;  %v4024_v41 = vsub.s32 0, %v4021_v40  ;;  %v122_v43 = vsub.s32 2, %v4021_v40 }
  0x68   :  { %2037 = vmatprep.subr.bf16.mxu0 %v3316_v44  ;;  %1993 = vmatpush1.bf16.msra.mxu1 %v3305_v45  ;;  %v3364_v12 = vld [vmem:[#allocation8 + $0x344] ss:$16 sps:$4 sm:$0xff]   ;;  %v3362_v15 = vld [vmem:[#allocation8 + $0x340] ss:$16 sps:$4 sm:$0xff]   ;;  %v4031_v44 = vsub.s32 1, %v4021_v40  ;;  %v126_v45 = vsub.s32 3, %v4021_v40 }
  0x69   :  { %1994 = vmatprep.subr.bf16.mxu1 %v3313_v46  ;;  %v3361_v14 = vld [vmem:[#allocation8 + $0x144] ss:$16 sps:$4 sm:$0xff]   ;;  %v3359_v17 = vld [vmem:[#allocation8 + $0x140] ss:$16 sps:$4 sm:$0xff]  }
  0x6a   :  { %v3370_v16 = vld [vmem:[#allocation8 + $0x364] ss:$16 sps:$4 sm:$0xff]   ;;  %v3368_v19 = vld [vmem:[#allocation8 + $0x360] ss:$16 sps:$4 sm:$0xff]  }
  0x6b   :  { %2038 = vmatpush1.bf16.msra.mxu0 %v3314_v47  ;;  %v3367_v18 = vld [vmem:[#allocation8 + $0x164] ss:$16 sps:$4 sm:$0xff]   ;;  %v3365_v21 = vld [vmem:[#allocation8 + $0x160] ss:$16 sps:$4 sm:$0xff]  }
  0x6c   :  { %2039 = vmatprep.subr.bf16.mxu0 %v3322_v48  ;;  %1995 = vmatpush1.bf16.msra.mxu1 %v3311_v49  ;;  %v3376_v20 = vld [vmem:[#allocation8 + $0x384] ss:$16 sps:$4 sm:$0xff]   ;;  %v3374_v23 = vld [vmem:[#allocation8 + $0x380] ss:$16 sps:$4 sm:$0xff]  }
  0x6d   :  { %1996 = vmatprep.subr.bf16.mxu1 %v3319_v50  ;;  %v3373_v22 = vld [vmem:[#allocation8 + $0x184] ss:$16 sps:$4 sm:$0xff]   ;;  %v3371_v25 = vld [vmem:[#allocation8 + $0x180] ss:$16 sps:$4 sm:$0xff]   ;;  %v130_v50 = vsub.s32 4, %v4021_v40 }
  0x6e   :  { %v3382_v24 = vld [vmem:[#allocation8 + $0x3a4] ss:$16 sps:$4 sm:$0xff]   ;;  %v3380_v27 = vld [vmem:[#allocation8 + $0x3a0] ss:$16 sps:$4 sm:$0xff]  }
  0x6f   :  { %2040 = vmatpush1.bf16.msra.mxu0 %v3320_v51  ;;  %v3379_v26 = vld [vmem:[#allocation8 + $0x1a4] ss:$16 sps:$4 sm:$0xff]   ;;  %v3377_v28 = vld [vmem:[#allocation8 + $0x1a0] ss:$16 sps:$4 sm:$0xff]  }
  0x70   :  { %2041 = vmatprep.subr.bf16.mxu0 %v3328_v52  ;;  %1997 = vmatpush1.bf16.msra.mxu1 %v3317_v53  ;;  %v3385_v29 = vld [vmem:[#allocation8 + $0x1c4] ss:$16 sps:$4 sm:$0xff]   ;;  %v3383_v31 = vld [vmem:[#allocation8 + $0x1c0] ss:$16 sps:$4 sm:$0xff]  }
  0x71   :  { %1998 = vmatprep.subr.bf16.mxu1 %v3325_v54  ;;  %v3388_v30 = vld [vmem:[#allocation8 + $0x3c4] ss:$16 sps:$4 sm:$0xff]   ;;  %v3386_v32 = vld [vmem:[#allocation8 + $0x3c0] ss:$16 sps:$4 sm:$0xff]  }
  0x72   :  { %v3391_v33 = vld [vmem:[#allocation8 + $0x1e4] ss:$16 sps:$4 sm:$0xff]   ;;  %v3389_v35 = vld [vmem:[#allocation8 + $0x1e0] ss:$16 sps:$4 sm:$0xff]  }
  0x73   :  { %2042 = vmatpush1.bf16.msra.mxu0 %v3326_v55  ;;  %v3394_v34 = vld [vmem:[#allocation8 + $0x3e4] ss:$16 sps:$4 sm:$0xff]   ;;  %v3392_v36 = vld [vmem:[#allocation8 + $0x3e0] ss:$16 sps:$4 sm:$0xff]  }
  0x74   :  { %2043 = vmatprep.subr.bf16.mxu0 %v3334_v56  ;;  %1999 = vmatpush1.bf16.msra.mxu1 %v3323_v57  ;;  %v3397_v37 = vld [vmem:[#allocation8 + $0x404] ss:$16 sps:$4 sm:$0xff]  }
  0x75   :  { %2000 = vmatprep.subr.bf16.mxu1 %v3331_v58  ;;  %v110_v42 = vld [vmem:[%s4114_s2] sm:$0xff] }
  0x76   :  { %v115_v46 = vrot.slane %v110_v42, %v4024_v41  ;;  %v123_v47 = vrot.slane %v110_v42, %v122_v43  ;;  %v119_v48 = vrot.slane %v110_v42, %v4031_v44  ;;  %v127_v49 = vrot.slane %v110_v42, %v126_v45 }
  0x77   :  { %2044 = vmatpush1.bf16.msra.mxu0 %v3332_v59  ;;  %v134_v59 = vsub.s32 5, %v4021_v40 }
  0x78   :  { %2045 = vmatprep.subr.bf16.mxu0 %v3340_v60  ;;  %2001 = vmatpush1.bf16.msra.mxu1 %v3329_v61 }
  0x79   :  { %2002 = vmatprep.subr.bf16.mxu1 %v3337_v62 }
  0x7b   :  { %2046 = vmatpush1.bf16.msra.mxu0 %v3338_v63 }
  0x7c   :  { %2047 = vmatprep.subr.bf16.mxu0 %v3346_v1  ;;  %2003 = vmatpush1.bf16.msra.mxu1 %v3335_v0  ;;  %v131_v0 = vrot.slane %v110_v42, %v130_v50  ;;  %v138_v1 = vsub.s32 6, %v4021_v40 }
  0x7d   :  { %2004 = vmatprep.subr.bf16.mxu1 %v3343_v2 }
  0x7f   :  { %2048 = vmatpush1.bf16.msra.mxu0 %v3344_v3 }
  0x80   :  { %2049 = vmatprep.subr.bf16.mxu0 %v3352_v4  ;;  %2005 = vmatpush1.bf16.msra.mxu1 %v3341_v5 }
  0x81   :  { %2006 = vmatprep.subr.bf16.mxu1 %v3349_v6  ;;  %v142_v6 = vsub.s32 7, %v4021_v40 }
  0x83   :  { %2050 = vmatpush1.bf16.msra.mxu0 %v3350_v7 }
  0x84   :  { %2051 = vmatprep.subr.bf16.mxu0 %v3358_v8  ;;  %2007 = vmatpush1.bf16.msra.mxu1 %v3347_v9 }
  0x85   :  { %2008 = vmatprep.subr.bf16.mxu1 %v3355_v10 }
  0x87   :  { %2052 = vmatpush1.bf16.msra.mxu0 %v3356_v11 }
  0x88   :  { %2053 = vmatprep.subr.bf16.mxu0 %v3364_v12  ;;  %2009 = vmatpush1.bf16.msra.mxu1 %v3353_v13 }
  0x89   :  { %2010 = vmatprep.subr.bf16.mxu1 %v3361_v14  ;;  %v135_v14 = vrot.slane %v110_v42, %v134_v59 }
  0x8b   :  { %2054 = vmatpush1.bf16.msra.mxu0 %v3362_v15 }
  0x8c   :  { %2055 = vmatprep.subr.bf16.mxu0 %v3370_v16  ;;  %2011 = vmatpush1.bf16.msra.mxu1 %v3359_v17  ;;  %v139_v17 = vrot.slane %v110_v42, %v138_v1 }
  0x8d   :  { %2012 = vmatprep.subr.bf16.mxu1 %v3367_v18 }
  0x8f   :  { %2056 = vmatpush1.bf16.msra.mxu0 %v3368_v19 }
  0x90   :  { %2057 = vmatprep.subr.bf16.mxu0 %v3376_v20  ;;  %2013 = vmatpush1.bf16.msra.mxu1 %v3365_v21  ;;  %v3398_v20 = vld [vmem:[#allocation8 + $0x8] ss:$16 sps:$4 sm:$0xff]  }
  0x91   :  { %2014 = vmatprep.subr.bf16.mxu1 %v3373_v22  ;;  %v143_v22 = vrot.slane %v110_v42, %v142_v6  ;;  %v3424_v6 = vld [vmem:[#allocation8 + $0x8c] ss:$16 sps:$4 sm:$0xff]  }
  0x93   :  { %2058 = vmatpush1.bf16.msra.mxu0 %v3374_v23 }
  0x94   :  { %2059 = vmatprep.subr.bf16.mxu0 %v3382_v24  ;;  %2015 = vmatpush1.bf16.msra.mxu1 %v3371_v25  ;;  %v3395_v24 = vld [vmem:[#allocation8 + $0x400] ss:$16 sps:$4 sm:$0xff]  }
  0x95   :  { %2016 = vmatprep.subr.bf16.mxu1 %v3379_v26 }
  0x97   :  { %2060 = vmatpush1.bf16.msra.mxu0 %v3380_v27  ;;  %v3403_v27 = vld [vmem:[#allocation8 + $0x424] ss:$16 sps:$4 sm:$0xff]  }
  0x98   :  { %2017 = vmatpush1.bf16.msra.mxu1 %v3377_v28  ;;  %2061 = vmatprep.subr.bf16.mxu0 %v3388_v30  ;;  %v3406_v28 = vld [vmem:[#allocation8 + $0x2c] ss:$16 sps:$4 sm:$0xff]  }
  0x99   :  { %2018 = vmatprep.subr.bf16.mxu1 %v3385_v29 }
  0x9b   :  { %2062 = vmatpush1.bf16.msra.mxu0 %v3386_v32 }
  0x9c   :  { %2019 = vmatpush1.bf16.msra.mxu1 %v3383_v31  ;;  %2063 = vmatprep.subr.bf16.mxu0 %v3394_v34 }
  0x9d   :  { %2020 = vmatprep.subr.bf16.mxu1 %v3391_v33 }
  0x9f   :  { %2064 = vmatpush1.bf16.msra.mxu0 %v3392_v36 }
  0xa0   :  { %2021 = vmatpush1.bf16.msra.mxu1 %v3389_v35  ;;  %2076 = vmatprep.subr.bf16.mxu0 %v3397_v37  ;;  %v3401_v37 = vld [vmem:[#allocation8 + $0x420] ss:$16 sps:$4 sm:$0xff]  }
  0xa1   :  { %2162 = vmatprep.subr.bf16.mxu1 %v3400_v38  ;;  %v3404_v38 = vld [vmem:[#allocation8 + $0x28] ss:$16 sps:$4 sm:$0xff]  }
 0x12d   :  { %v270_v51 = vpop.f32.mrb[0].mxu0  ;;  %v313_v53 = vpop.f32.mrb[0].mxu1 }
 0x12e   :  { %v271_v52 = vadd.f32 %v270_v51, %v115_v46  ;;  %v272_v54 = vpop.f32.mrb[1].mxu0  ;;  %v314_v55 = vadd.f32 %v313_v53, %v123_v47  ;;  %v315_v57 = vpop.f32.mrb[1].mxu1 }
 0x12f   :  { %v273_v56 = vadd.f32 %v272_v54, %v119_v48  ;;  %v274_v58 = vpop.f32.mrb[2].mxu0  ;;  %v316_v60 = vadd.f32 %v315_v57, %v127_v49  ;;  %v317_v62 = vpop.f32.mrb[2].mxu1  ;;  %v3409_v54 = vld [vmem:[#allocation8 + $0x444] ss:$16 sps:$4 sm:$0xff]  }
 0x130   :  { %v275_v61 = vadd.f32 %v274_v58, %v115_v46  ;;  %v276_v63 = vpop.f32.mrb[3].mxu0  ;;  %v410_v2 = vmax.f32 %v314_v55, 0.0  ;;  %v318_v3 = vadd.f32 %v317_v62, %v123_v47  ;;  %v319_v5 = vpop.f32.mrb[3].mxu1  ;;  %v408_v7 = vmax.f32 %v271_v52, 0.0 }
 0x131   :  { %v277_v4 = vadd.f32 %v276_v63, %v119_v48  ;;  %v411_v8 = vmax.f32 %v316_v60, 0.0  ;;  %v320_v10 = vadd.f32 %v319_v5, %v127_v49  ;;  %v409_v11 = vmax.f32 %v273_v56, 0.0  ;;  %v3412_v49 = vld [vmem:[#allocation8 + $0x4c] ss:$16 sps:$4 sm:$0xff]   ;;  %v3410_v60 = vld [vmem:[#allocation8 + $0x48] ss:$16 sps:$4 sm:$0xff]  }
 0x132   :  { %v416_v9 = vmax.f32 %v275_v61, 0.0  ;;  %v418_v12 = vmax.f32 %v318_v3, 0.0  ;;  %v3407_v63 = vld [vmem:[#allocation8 + $0x440] ss:$16 sps:$4 sm:$0xff]  }
 0x133   :  { %v417_v13 = vmax.f32 %v277_v4, 0.0  ;;  %v419_v16 = vmax.f32 %v320_v10, 0.0  ;;  %v3416_v4 = vld [vmem:[#allocation8 + $0x68] ss:$16 sps:$4 sm:$0xff]   ;;  %v3413_v5 = vld [vmem:[#allocation8 + $0x460] ss:$16 sps:$4 sm:$0xff]  }
 0x134   :  { %v4044_v15 = vpack.c.bf16 %v416_v9, %v408_v7  ;;  %v4046_v18 = vpack.c.bf16 %v418_v12, %v410_v2  ;;  %v3415_v2 = vld [vmem:[#allocation8 + $0x464] ss:$16 sps:$4 sm:$0xff]   ;;  %v3419_v9 = vld [vmem:[#allocation8 + $0x480] ss:$16 sps:$4 sm:$0xff]   ;;  %v3430_v10 = vld [vmem:[#allocation8 + $0xac] ss:$16 sps:$4 sm:$0xff]  }
 0x135   :  { %v425_v19 = vpack.c.bf16 %v417_v13, %v409_v11  ;;  %v356_v21 = vpop.f32.mrb[4].mxu0  ;;  %v4048_v23 = vpack.c.bf16 %v419_v16, %v411_v8  ;;  %v3421_v7 = vld [vmem:[#allocation8 + $0x484] ss:$16 sps:$4 sm:$0xff]   ;;  %v3422_v8 = vld [vmem:[#allocation8 + $0x88] ss:$16 sps:$4 sm:$0xff]  }
 0x136   :  { %v357_v25 = vadd.f32 %v356_v21, %v131_v0  ;;  %v358_v26 = vpop.f32.mrb[5].mxu0  ;;  %v399_v31 = vpop.f32.mrb[4].mxu1  ;;  %v3427_v11 = vld [vmem:[#allocation8 + $0x4a4] ss:$16 sps:$4 sm:$0xff]   ;;  %v3428_v12 = vld [vmem:[#allocation8 + $0xa8] ss:$16 sps:$4 sm:$0xff]  }
 0x137   :  { %2022 = vmatprep.mubr.bf16.mxu1 %v425_v19  ;;  %v359_v29 = vadd.f32 %v358_v26, %v135_v14  ;;  %v360_v30 = vpop.f32.mrb[6].mxu0  ;;  %2065 = vmatprep.mubr.bf16.mxu0 %v4048_v23  ;;  %v400_v35 = vadd.f32 %v399_v31, %v139_v17  ;;  %v401_v36 = vpop.f32.mrb[5].mxu1  ;;  %v3425_v13 = vld [vmem:[#allocation8 + $0x4a0] ss:$16 sps:$4 sm:$0xff]   ;;  %v3433_v16 = vld [vmem:[#allocation8 + $0x4c4] ss:$16 sps:$4 sm:$0xff]  }
 0x138   :  { %2023 = vmatmul.mubr.bf16.vlgmr.msra.gmra.mrb[8].mxu1 %v4044_v15  ;;  %v412_v32 = vmax.f32 %v357_v25, 0.0  ;;  %v361_v33 = vadd.f32 %v360_v30, %v131_v0  ;;  %v362_v34 = vpop.f32.mrb[7].mxu0  ;;  %2066 = vmatmul.mubr.bf16.vlgmr.msra.gmra.mrb[8].mxu0 %v4046_v18  ;;  %v402_v47 = vadd.f32 %v401_v36, %v143_v22  ;;  %v403_v48 = vpop.f32.mrb[6].mxu1  ;;  %v3418_v0 = vld [vmem:[#allocation8 + $0x6c] ss:$16 sps:$4 sm:$0xff]  }
 0x139   :  { %2163 = vmatpush1.bf16.msra.mxu1 %v3398_v20  ;;  %v413_v42 = vmax.f32 %v359_v29, 0.0  ;;  %v363_v46 = vadd.f32 %v362_v34, %v135_v14  ;;  %2077 = vmatpush1.bf16.msra.mxu0 %v3395_v24  ;;  %v414_v51 = vmax.f32 %v400_v35, 0.0  ;;  %v404_v52 = vadd.f32 %v403_v48, %v139_v17  ;;  %v405_v53 = vpop.f32.mrb[7].mxu1  ;;  %v3436_v14 = vld [vmem:[#allocation8 + $0xcc] ss:$16 sps:$4 sm:$0xff]  }
 0x13a   :  { %2194 = vmatprep.mubr.bf16.mxu1 %v425_v19  ;;  %v420_v50 = vmax.f32 %v361_v33, 0.0  ;;  %2078 = vmatprep.subr.bf16.mxu0 %v3403_v27  ;;  %v415_v56 = vmax.f32 %v402_v47, 0.0  ;;  %v406_v57 = vadd.f32 %v405_v53, %v143_v22  ;;  %v3434_v17 = vld [vmem:[#allocation8 + $0xc8] ss:$16 sps:$4 sm:$0xff]   ;;  %v3431_v19 = vld [vmem:[#allocation8 + $0x4c0] ss:$16 sps:$4 sm:$0xff]  }
 0x13b   :  { %2164 = vmatprep.subr.bf16.mxu1 %v3406_v28  ;;  %v421_v55 = vmax.f32 %v363_v46, 0.0  ;;  %v422_v59 = vmax.f32 %v404_v52, 0.0  ;;  %v3442_v20 = vld [vmem:[#allocation8 + $0xec] ss:$16 sps:$4 sm:$0xff]   ;;  %v3439_v21 = vld [vmem:[#allocation8 + $0x4e4] ss:$16 sps:$4 sm:$0xff]  }
 0x13c   :  { %v4053_v58 = vpack.c.bf16 %v420_v50, %v412_v32  ;;  %v423_v62 = vmax.f32 %v406_v57, 0.0  ;;  %v3440_v22 = vld [vmem:[#allocation8 + $0xe8] ss:$16 sps:$4 sm:$0xff]   ;;  %v3437_v24 = vld [vmem:[#allocation8 + $0x4e0] ss:$16 sps:$4 sm:$0xff]  }
 0x13d   :  { %2165 = vmatpush1.bf16.msra.mxu1 %v3404_v38  ;;  %v4055_v61 = vpack.c.bf16 %v421_v55, %v413_v42  ;;  %2079 = vmatpush1.bf16.msra.mxu0 %v3401_v37  ;;  %v4057_v1 = vpack.c.bf16 %v422_v59, %v414_v51  ;;  %v3448_v25 = vld [vmem:[#allocation8 + $0x10c] ss:$16 sps:$4 sm:$0xff]   ;;  %v3445_v26 = vld [vmem:[#allocation8 + $0x504] ss:$16 sps:$4 sm:$0xff]   ;;  %v3446_v27 = vld [vmem:[#allocation8 + $0x108] ss:$16 sps:$4 sm:$0xff]  }
 0x13e   :  { %2166 = vmatprep.subr.bf16.mxu1 %v3412_v49  ;;  %2080 = vmatprep.subr.bf16.mxu0 %v3409_v54  ;;  %v4060_v3 = vpack.c.bf16 %v423_v62, %v415_v56  ;;  %v3443_v28 = vld [vmem:[#allocation8 + $0x500] ss:$16 sps:$4 sm:$0xff]   ;;  %v3454_v29 = vld [vmem:[#allocation8 + $0x12c] ss:$16 sps:$4 sm:$0xff]   ;;  %v3451_v30 = vld [vmem:[#allocation8 + $0x524] ss:$16 sps:$4 sm:$0xff]  }
 0x13f   :  { %2108 = vmatprep.mubr.bf16.mxu0 %v4055_v61  ;;  %v3452_v31 = vld [vmem:[#allocation8 + $0x128] ss:$16 sps:$4 sm:$0xff]   ;;  %v3449_v32 = vld [vmem:[#allocation8 + $0x520] ss:$16 sps:$4 sm:$0xff]   ;;  %v3460_v33 = vld [vmem:[#allocation8 + $0x14c] ss:$16 sps:$4 sm:$0xff]  }
 0x140   :  { %v3457_v34 = vld [vmem:[#allocation8 + $0x544] ss:$16 sps:$4 sm:$0xff]   ;;  %v3458_v35 = vld [vmem:[#allocation8 + $0x148] ss:$16 sps:$4 sm:$0xff]   ;;  %v3455_v36 = vld [vmem:[#allocation8 + $0x540] ss:$16 sps:$4 sm:$0xff]  }
 0x141   :  { %2167 = vmatpush1.bf16.msra.mxu1 %v3410_v60  ;;  %2081 = vmatpush1.bf16.msra.mxu0 %v3407_v63  ;;  %v3466_v37 = vld [vmem:[#allocation8 + $0x16c] ss:$16 sps:$4 sm:$0xff]   ;;  %v3463_v38 = vld [vmem:[#allocation8 + $0x564] ss:$16 sps:$4 sm:$0xff]   ;;  %v3464_v42 = vld [vmem:[#allocation8 + $0x168] ss:$16 sps:$4 sm:$0xff]  }
 0x142   :  { %2168 = vmatprep.subr.bf16.mxu1 %v3418_v0  ;;  %2082 = vmatprep.subr.bf16.mxu0 %v3415_v2  ;;  %v3461_v46 = vld [vmem:[#allocation8 + $0x560] ss:$16 sps:$4 sm:$0xff]   ;;  %v3472_v47 = vld [vmem:[#allocation8 + $0x18c] ss:$16 sps:$4 sm:$0xff]   ;;  %v3469_v48 = vld [vmem:[#allocation8 + $0x584] ss:$16 sps:$4 sm:$0xff]  }
 0x143   :  { %v3470_v49 = vld [vmem:[#allocation8 + $0x188] ss:$16 sps:$4 sm:$0xff]   ;;  %v3467_v50 = vld [vmem:[#allocation8 + $0x580] ss:$16 sps:$4 sm:$0xff]   ;;  %v3478_v51 = vld [vmem:[#allocation8 + $0x1ac] ss:$16 sps:$4 sm:$0xff]  }
 0x144   :  { %v3475_v52 = vld [vmem:[#allocation8 + $0x5a4] ss:$16 sps:$4 sm:$0xff]   ;;  %v3476_v53 = vld [vmem:[#allocation8 + $0x1a8] ss:$16 sps:$4 sm:$0xff]   ;;  %v3473_v54 = vld [vmem:[#allocation8 + $0x5a0] ss:$16 sps:$4 sm:$0xff]  }
 0x145   :  { %2169 = vmatpush1.bf16.msra.mxu1 %v3416_v4  ;;  %2083 = vmatpush1.bf16.msra.mxu0 %v3413_v5  ;;  %v3484_v55 = vld [vmem:[#allocation8 + $0x1cc] ss:$16 sps:$4 sm:$0xff]   ;;  %v3481_v56 = vld [vmem:[#allocation8 + $0x5c4] ss:$16 sps:$4 sm:$0xff]   ;;  %v3482_v57 = vld [vmem:[#allocation8 + $0x1c8] ss:$16 sps:$4 sm:$0xff]  }
 0x146   :  { %2170 = vmatprep.subr.bf16.mxu1 %v3424_v6  ;;  %2084 = vmatprep.subr.bf16.mxu0 %v3421_v7  ;;  %v3479_v59 = vld [vmem:[#allocation8 + $0x5c0] ss:$16 sps:$4 sm:$0xff]   ;;  %v3490_v60 = vld [vmem:[#allocation8 + $0x1ec] ss:$16 sps:$4 sm:$0xff]   ;;  %v3487_v62 = vld [vmem:[#allocation8 + $0x5e4] ss:$16 sps:$4 sm:$0xff]  }
 0x147   :  { %v3488_v63 = vld [vmem:[#allocation8 + $0x1e8] ss:$16 sps:$4 sm:$0xff]   ;;  %v3485_v0 = vld [vmem:[#allocation8 + $0x5e0] ss:$16 sps:$4 sm:$0xff]   ;;  %v3496_v2 = vld [vmem:[#allocation8 + $0x20c] ss:$16 sps:$4 sm:$0xff]  }
 0x148   :  { %v3493_v4 = vld [vmem:[#allocation8 + $0x604] ss:$16 sps:$4 sm:$0xff]   ;;  %v3494_v5 = vld [vmem:[#allocation8 + $0x208] ss:$16 sps:$4 sm:$0xff]   ;;  %v3491_v6 = vld [vmem:[#allocation8 + $0x600] ss:$16 sps:$4 sm:$0xff]  }
 0x149   :  { %2171 = vmatpush1.bf16.msra.mxu1 %v3422_v8  ;;  %2085 = vmatpush1.bf16.msra.mxu0 %v3419_v9  ;;  %v3499_v7 = vld [vmem:[#allocation8 + $0x624] ss:$16 sps:$4 sm:$0xff]   ;;  %v3502_v8 = vld [vmem:[#allocation8 + $0x22c] ss:$16 sps:$4 sm:$0xff]   ;;  %v3500_v9 = vld [vmem:[#allocation8 + $0x228] ss:$16 sps:$4 sm:$0xff]  }
 0x14a   :  { %2172 = vmatprep.subr.bf16.mxu1 %v3430_v10  ;;  %2086 = vmatprep.subr.bf16.mxu0 %v3427_v11  ;;  %v3497_v10 = vld [vmem:[#allocation8 + $0x620] ss:$16 sps:$4 sm:$0xff]   ;;  %v3508_v11 = vld [vmem:[#allocation8 + $0x24c] ss:$16 sps:$4 sm:$0xff]  }
 0x14d   :  { %2173 = vmatpush1.bf16.msra.mxu1 %v3428_v12  ;;  %2087 = vmatpush1.bf16.msra.mxu0 %v3425_v13  ;;  %v3505_v12 = vld [vmem:[#allocation8 + $0x644] ss:$16 sps:$4 sm:$0xff]   ;;  %v3506_v13 = vld [vmem:[#allocation8 + $0x248] ss:$16 sps:$4 sm:$0xff]  }
 0x14e   :  { %2174 = vmatprep.subr.bf16.mxu1 %v3436_v14  ;;  %2088 = vmatprep.subr.bf16.mxu0 %v3433_v16  ;;  %v3503_v14 = vld [vmem:[#allocation8 + $0x640] ss:$16 sps:$4 sm:$0xff]   ;;  %v3511_v16 = vld [vmem:[#allocation8 + $0x664] ss:$16 sps:$4 sm:$0xff]  }
 0x151   :  { %2175 = vmatpush1.bf16.msra.mxu1 %v3434_v17  ;;  %2089 = vmatpush1.bf16.msra.mxu0 %v3431_v19  ;;  %v3512_v17 = vld [vmem:[#allocation8 + $0x268] ss:$16 sps:$4 sm:$0xff]   ;;  %v3509_v19 = vld [vmem:[#allocation8 + $0x660] ss:$16 sps:$4 sm:$0xff]  }
 0x152   :  { %2176 = vmatprep.subr.bf16.mxu1 %v3442_v20  ;;  %2090 = vmatprep.subr.bf16.mxu0 %v3439_v21  ;;  %v3517_v20 = vld [vmem:[#allocation8 + $0x684] ss:$16 sps:$4 sm:$0xff]   ;;  %v3518_v21 = vld [vmem:[#allocation8 + $0x288] ss:$16 sps:$4 sm:$0xff]  }
 0x155   :  { %2177 = vmatpush1.bf16.msra.mxu1 %v3440_v22  ;;  %2091 = vmatpush1.bf16.msra.mxu0 %v3437_v24  ;;  %v3515_v22 = vld [vmem:[#allocation8 + $0x680] ss:$16 sps:$4 sm:$0xff]   ;;  %v3526_v24 = vld [vmem:[#allocation8 + $0x2ac] ss:$16 sps:$4 sm:$0xff]  }
 0x156   :  { %2178 = vmatprep.subr.bf16.mxu1 %v3448_v25  ;;  %2092 = vmatprep.subr.bf16.mxu0 %v3445_v26  ;;  %v3523_v25 = vld [vmem:[#allocation8 + $0x6a4] ss:$16 sps:$4 sm:$0xff]   ;;  %v3524_v26 = vld [vmem:[#allocation8 + $0x2a8] ss:$16 sps:$4 sm:$0xff]  }
 0x159   :  { %2179 = vmatpush1.bf16.msra.mxu1 %v3446_v27  ;;  %2093 = vmatpush1.bf16.msra.mxu0 %v3443_v28  ;;  %v3521_v27 = vld [vmem:[#allocation8 + $0x6a0] ss:$16 sps:$4 sm:$0xff]   ;;  %v3532_v28 = vld [vmem:[#allocation8 + $0x2cc] ss:$16 sps:$4 sm:$0xff]  }
 0x15a   :  { %2180 = vmatprep.subr.bf16.mxu1 %v3454_v29  ;;  %2094 = vmatprep.subr.bf16.mxu0 %v3451_v30  ;;  %v3529_v29 = vld [vmem:[#allocation8 + $0x6c4] ss:$16 sps:$4 sm:$0xff]   ;;  %v3530_v30 = vld [vmem:[#allocation8 + $0x2c8] ss:$16 sps:$4 sm:$0xff]  }
 0x15d   :  { %2181 = vmatpush1.bf16.msra.mxu1 %v3452_v31  ;;  %2095 = vmatpush1.bf16.msra.mxu0 %v3449_v32  ;;  %v3527_v31 = vld [vmem:[#allocation8 + $0x6c0] ss:$16 sps:$4 sm:$0xff]   ;;  %v3538_v32 = vld [vmem:[#allocation8 + $0x2ec] ss:$16 sps:$4 sm:$0xff]  }
 0x15e   :  { %2182 = vmatprep.subr.bf16.mxu1 %v3460_v33  ;;  %2096 = vmatprep.subr.bf16.mxu0 %v3457_v34  ;;  %v3535_v33 = vld [vmem:[#allocation8 + $0x6e4] ss:$16 sps:$4 sm:$0xff]   ;;  %v3536_v34 = vld [vmem:[#allocation8 + $0x2e8] ss:$16 sps:$4 sm:$0xff]  }
 0x161   :  { %2183 = vmatpush1.bf16.msra.mxu1 %v3458_v35  ;;  %2097 = vmatpush1.bf16.msra.mxu0 %v3455_v36  ;;  %v3533_v35 = vld [vmem:[#allocation8 + $0x6e0] ss:$16 sps:$4 sm:$0xff]   ;;  %v3544_v36 = vld [vmem:[#allocation8 + $0x30c] ss:$16 sps:$4 sm:$0xff]  }
 0x162   :  { %2184 = vmatprep.subr.bf16.mxu1 %v3466_v37  ;;  %2098 = vmatprep.subr.bf16.mxu0 %v3463_v38  ;;  %v3541_v37 = vld [vmem:[#allocation8 + $0x704] ss:$16 sps:$4 sm:$0xff]   ;;  %v3542_v38 = vld [vmem:[#allocation8 + $0x308] ss:$16 sps:$4 sm:$0xff]  }
 0x165   :  { %2185 = vmatpush1.bf16.msra.mxu1 %v3464_v42  ;;  %2099 = vmatpush1.bf16.msra.mxu0 %v3461_v46  ;;  %v3539_v42 = vld [vmem:[#allocation8 + $0x700] ss:$16 sps:$4 sm:$0xff]   ;;  %v3550_v46 = vld [vmem:[#allocation8 + $0x32c] ss:$16 sps:$4 sm:$0xff]  }
 0x166   :  { %2186 = vmatprep.subr.bf16.mxu1 %v3472_v47  ;;  %2100 = vmatprep.subr.bf16.mxu0 %v3469_v48  ;;  %v3547_v47 = vld [vmem:[#allocation8 + $0x724] ss:$16 sps:$4 sm:$0xff]   ;;  %v3548_v48 = vld [vmem:[#allocation8 + $0x328] ss:$16 sps:$4 sm:$0xff]  }
 0x169   :  { %2187 = vmatpush1.bf16.msra.mxu1 %v3470_v49  ;;  %2101 = vmatpush1.bf16.msra.mxu0 %v3467_v50  ;;  %v3545_v49 = vld [vmem:[#allocation8 + $0x720] ss:$16 sps:$4 sm:$0xff]   ;;  %v3556_v50 = vld [vmem:[#allocation8 + $0x34c] ss:$16 sps:$4 sm:$0xff]  }
 0x16a   :  { %2188 = vmatprep.subr.bf16.mxu1 %v3478_v51  ;;  %2102 = vmatprep.subr.bf16.mxu0 %v3475_v52  ;;  %v3553_v51 = vld [vmem:[#allocation8 + $0x744] ss:$16 sps:$4 sm:$0xff]   ;;  %v3554_v52 = vld [vmem:[#allocation8 + $0x348] ss:$16 sps:$4 sm:$0xff]  }
 0x16d   :  { %2189 = vmatpush1.bf16.msra.mxu1 %v3476_v53  ;;  %2103 = vmatpush1.bf16.msra.mxu0 %v3473_v54  ;;  %v3551_v53 = vld [vmem:[#allocation8 + $0x740] ss:$16 sps:$4 sm:$0xff]   ;;  %v3562_v54 = vld [vmem:[#allocation8 + $0x36c] ss:$16 sps:$4 sm:$0xff]  }
 0x16e   :  { %2190 = vmatprep.subr.bf16.mxu1 %v3484_v55  ;;  %2104 = vmatprep.subr.bf16.mxu0 %v3481_v56  ;;  %v3559_v55 = vld [vmem:[#allocation8 + $0x764] ss:$16 sps:$4 sm:$0xff]   ;;  %v3560_v56 = vld [vmem:[#allocation8 + $0x368] ss:$16 sps:$4 sm:$0xff]  }
 0x171   :  { %2191 = vmatpush1.bf16.msra.mxu1 %v3482_v57  ;;  %2105 = vmatpush1.bf16.msra.mxu0 %v3479_v59  ;;  %v3557_v57 = vld [vmem:[#allocation8 + $0x760] ss:$16 sps:$4 sm:$0xff]   ;;  %v3568_v59 = vld [vmem:[#allocation8 + $0x38c] ss:$16 sps:$4 sm:$0xff]  }
 0x172   :  { %2192 = vmatprep.subr.bf16.mxu1 %v3490_v60  ;;  %2106 = vmatprep.subr.bf16.mxu0 %v3487_v62  ;;  %v3565_v60 = vld [vmem:[#allocation8 + $0x784] ss:$16 sps:$4 sm:$0xff]   ;;  %v3566_v62 = vld [vmem:[#allocation8 + $0x388] ss:$16 sps:$4 sm:$0xff]  }
 0x175   :  { %2193 = vmatpush1.bf16.msra.mxu1 %v3488_v63  ;;  %2107 = vmatpush1.bf16.msra.mxu0 %v3485_v0  ;;  %v3563_v63 = vld [vmem:[#allocation8 + $0x780] ss:$16 sps:$4 sm:$0xff]   ;;  %v3574_v0 = vld [vmem:[#allocation8 + $0x3ac] ss:$16 sps:$4 sm:$0xff]  }
 0x176   :  { %2205 = vmatprep.subr.bf16.mxu1 %v3496_v2  ;;  %2119 = vmatprep.subr.bf16.mxu0 %v3493_v4  ;;  %v3571_v2 = vld [vmem:[#allocation8 + $0x7a4] ss:$16 sps:$4 sm:$0xff]   ;;  %v3572_v4 = vld [vmem:[#allocation8 + $0x3a8] ss:$16 sps:$4 sm:$0xff]  }
 0x178   :  { %2195 = vmatmul.mubr.bf16.vlgmr.msra.gmra.mrb[12].mxu1 %v4044_v15  ;;  %2109 = vmatmul.mubr.bf16.vlgmr.msra.gmra.mrb[8].mxu0 %v4053_v58  ;;  %v3514_v15 = vld [vmem:[#allocation8 + $0x26c] ss:$16 sps:$4 sm:$0xff]  }
 0x179   :  { %2206 = vmatpush1.bf16.msra.mxu1 %v3494_v5  ;;  %2120 = vmatpush1.bf16.msra.mxu0 %v3491_v6  ;;  %v3569_v5 = vld [vmem:[#allocation8 + $0x7a0] ss:$16 sps:$4 sm:$0xff]   ;;  %v3580_v6 = vld [vmem:[#allocation8 + $0x3cc] ss:$16 sps:$4 sm:$0xff]  }
 0x17a   :  { %2237 = vmatprep.mubr.bf16.mxu1 %v4048_v23  ;;  %2121 = vmatprep.subr.bf16.mxu0 %v3499_v7  ;;  %v3520_v23 = vld [vmem:[#allocation8 + $0x28c] ss:$16 sps:$4 sm:$0xff]   ;;  %v3577_v7 = vld [vmem:[#allocation8 + $0x7c4] ss:$16 sps:$4 sm:$0xff]  }
 0x17b   :  { %2207 = vmatprep.subr.bf16.mxu1 %v3502_v8  ;;  %2151 = vmatprep.mubr.bf16.mxu0 %v4060_v3  ;;  %v3578_v8 = vld [vmem:[#allocation8 + $0x3c8] ss:$16 sps:$4 sm:$0xff]  }
 0x17d   :  { %2208 = vmatpush1.bf16.msra.mxu1 %v3500_v9  ;;  %2122 = vmatpush1.bf16.msra.mxu0 %v3497_v10  ;;  %v3575_v9 = vld [vmem:[#allocation8 + $0x7c0] ss:$16 sps:$4 sm:$0xff]   ;;  %v3586_v10 = vld [vmem:[#allocation8 + $0x3ec] ss:$16 sps:$4 sm:$0xff]  }
 0x17e   :  { %2209 = vmatprep.subr.bf16.mxu1 %v3508_v11  ;;  %2123 = vmatprep.subr.bf16.mxu0 %v3505_v12  ;;  %v3583_v11 = vld [vmem:[#allocation8 + $0x7e4] ss:$16 sps:$4 sm:$0xff]   ;;  %v3584_v12 = vld [vmem:[#allocation8 + $0x3e8] ss:$16 sps:$4 sm:$0xff]  }
 0x181   :  { %2210 = vmatpush1.bf16.msra.mxu1 %v3506_v13  ;;  %2124 = vmatpush1.bf16.msra.mxu0 %v3503_v14  ;;  %v3581_v13 = vld [vmem:[#allocation8 + $0x7e0] ss:$16 sps:$4 sm:$0xff]   ;;  %v3589_v14 = vld [vmem:[#allocation8 + $0x40c] ss:$16 sps:$4 sm:$0xff]  }
 0x182   :  { %2211 = vmatprep.subr.bf16.mxu1 %v3514_v15  ;;  %2125 = vmatprep.subr.bf16.mxu0 %v3511_v16  ;;  %v3587_v15 = vld [vmem:[#allocation8 + $0x408] ss:$16 sps:$4 sm:$0xff]   ;;  %v3592_v16 = vld [vmem:[#allocation8 + $0x42c] ss:$16 sps:$4 sm:$0xff]  }
 0x185   :  { %2212 = vmatpush1.bf16.msra.mxu1 %v3512_v17  ;;  %2126 = vmatpush1.bf16.msra.mxu0 %v3509_v19  ;;  %v3683_v17 = vld [vmem:[#allocation9] ss:$8 sps:$4 sm:$0xff]   ;;  %v3685_v19 = vld [vmem:[#allocation9 + $0x4] ss:$8 sps:$4 sm:$0xff]  }
 0x186   :  { %2213 = vmatprep.subr.bf16.mxu1 %v3520_v23  ;;  %2127 = vmatprep.subr.bf16.mxu0 %v3517_v20  ;;  %v3590_v23 = vld [vmem:[#allocation8 + $0x428] ss:$16 sps:$4 sm:$0xff]   ;;  %v3688_v20 = vld [vmem:[#allocation9 + $0x14] ss:$8 sps:$4 sm:$0xff]  }
 0x189   :  { %2214 = vmatpush1.bf16.msra.mxu1 %v3518_v21  ;;  %2128 = vmatpush1.bf16.msra.mxu0 %v3515_v22  ;;  %v3595_v21 = vld [vmem:[#allocation8 + $0x44c] ss:$16 sps:$4 sm:$0xff]   ;;  %v3686_v22 = vld [vmem:[#allocation9 + $0x10] ss:$8 sps:$4 sm:$0xff]  }
 0x18a   :  { %2215 = vmatprep.subr.bf16.mxu1 %v3526_v24  ;;  %2129 = vmatprep.subr.bf16.mxu0 %v3523_v25  ;;  %v3593_v24 = vld [vmem:[#allocation8 + $0x448] ss:$16 sps:$4 sm:$0xff]   ;;  %v3691_v25 = vld [vmem:[#allocation9 + $0x24] ss:$8 sps:$4 sm:$0xff]  }
 0x18d   :  { %2216 = vmatpush1.bf16.msra.mxu1 %v3524_v26  ;;  %2130 = vmatpush1.bf16.msra.mxu0 %v3521_v27  ;;  %v3689_v26 = vld [vmem:[#allocation9 + $0x20] ss:$8 sps:$4 sm:$0xff]  }
 0x18e   :  { %2217 = vmatprep.subr.bf16.mxu1 %v3532_v28  ;;  %2131 = vmatprep.subr.bf16.mxu0 %v3529_v29  ;;  %v3596_v27 = vld [vmem:[#allocation8 + $0x468] ss:$16 sps:$4 sm:$0xff]   ;;  %v3694_v28 = vld [vmem:[#allocation9 + $0x34] ss:$8 sps:$4 sm:$0xff]  }
 0x18f   :  { %v3601_v29 = vld [vmem:[#allocation8 + $0x48c] ss:$16 sps:$4 sm:$0xff]  }
 0x191   :  { %2218 = vmatpush1.bf16.msra.mxu1 %v3530_v30  ;;  %2132 = vmatpush1.bf16.msra.mxu0 %v3527_v31  ;;  %v3599_v30 = vld [vmem:[#allocation8 + $0x488] ss:$16 sps:$4 sm:$0xff]   ;;  %v3697_v31 = vld [vmem:[#allocation9 + $0x44] ss:$8 sps:$4 sm:$0xff]  }
 0x192   :  { %2219 = vmatprep.subr.bf16.mxu1 %v3538_v32  ;;  %2133 = vmatprep.subr.bf16.mxu0 %v3535_v33  ;;  %v3604_v32 = vld [vmem:[#allocation8 + $0x4ac] ss:$16 sps:$4 sm:$0xff]   ;;  %v3695_v33 = vld [vmem:[#allocation9 + $0x40] ss:$8 sps:$4 sm:$0xff]  }
 0x195   :  { %2220 = vmatpush1.bf16.msra.mxu1 %v3536_v34  ;;  %2134 = vmatpush1.bf16.msra.mxu0 %v3533_v35  ;;  %v3602_v34 = vld [vmem:[#allocation8 + $0x4a8] ss:$16 sps:$4 sm:$0xff]   ;;  %v3700_v35 = vld [vmem:[#allocation9 + $0x54] ss:$8 sps:$4 sm:$0xff]  }
 0x196   :  { %2221 = vmatprep.subr.bf16.mxu1 %v3544_v36  ;;  %2135 = vmatprep.subr.bf16.mxu0 %v3541_v37  ;;  %v3607_v36 = vld [vmem:[#allocation8 + $0x4cc] ss:$16 sps:$4 sm:$0xff]   ;;  %v3698_v37 = vld [vmem:[#allocation9 + $0x50] ss:$8 sps:$4 sm:$0xff]  }
 0x199   :  { %2222 = vmatpush1.bf16.msra.mxu1 %v3542_v38  ;;  %2136 = vmatpush1.bf16.msra.mxu0 %v3539_v42  ;;  %v3605_v38 = vld [vmem:[#allocation8 + $0x4c8] ss:$16 sps:$4 sm:$0xff]   ;;  %v3703_v42 = vld [vmem:[#allocation9 + $0x64] ss:$8 sps:$4 sm:$0xff]  }
 0x19a   :  { %2223 = vmatprep.subr.bf16.mxu1 %v3550_v46  ;;  %2137 = vmatprep.subr.bf16.mxu0 %v3547_v47  ;;  %v3610_v46 = vld [vmem:[#allocation8 + $0x4ec] ss:$16 sps:$4 sm:$0xff]   ;;  %v3701_v47 = vld [vmem:[#allocation9 + $0x60] ss:$8 sps:$4 sm:$0xff]  }
 0x19d   :  { %2224 = vmatpush1.bf16.msra.mxu1 %v3548_v48  ;;  %2138 = vmatpush1.bf16.msra.mxu0 %v3545_v49  ;;  %v3608_v48 = vld [vmem:[#allocation8 + $0x4e8] ss:$16 sps:$4 sm:$0xff]   ;;  %v3706_v49 = vld [vmem:[#allocation9 + $0x74] ss:$8 sps:$4 sm:$0xff]  }
 0x19e   :  { %2225 = vmatprep.subr.bf16.mxu1 %v3556_v50  ;;  %2139 = vmatprep.subr.bf16.mxu0 %v3553_v51  ;;  %v3613_v50 = vld [vmem:[#allocation8 + $0x50c] ss:$16 sps:$4 sm:$0xff]   ;;  %v3704_v51 = vld [vmem:[#allocation9 + $0x70] ss:$8 sps:$4 sm:$0xff]  }
 0x1a1   :  { %2226 = vmatpush1.bf16.msra.mxu1 %v3554_v52  ;;  %2140 = vmatpush1.bf16.msra.mxu0 %v3551_v53  ;;  %v3611_v52 = vld [vmem:[#allocation8 + $0x508] ss:$16 sps:$4 sm:$0xff]   ;;  %v3709_v53 = vld [vmem:[#allocation9 + $0x84] ss:$8 sps:$4 sm:$0xff]  }
 0x1a2   :  { %2227 = vmatprep.subr.bf16.mxu1 %v3562_v54  ;;  %2141 = vmatprep.subr.bf16.mxu0 %v3559_v55  ;;  %v3616_v54 = vld [vmem:[#allocation8 + $0x52c] ss:$16 sps:$4 sm:$0xff]   ;;  %v3707_v55 = vld [vmem:[#allocation9 + $0x80] ss:$8 sps:$4 sm:$0xff]  }
 0x1a5   :  { %2228 = vmatpush1.bf16.msra.mxu1 %v3560_v56  ;;  %2142 = vmatpush1.bf16.msra.mxu0 %v3557_v57  ;;  %v3614_v56 = vld [vmem:[#allocation8 + $0x528] ss:$16 sps:$4 sm:$0xff]   ;;  %v3712_v57 = vld [vmem:[#allocation9 + $0x94] ss:$8 sps:$4 sm:$0xff]  }
 0x1a6   :  { %2229 = vmatprep.subr.bf16.mxu1 %v3568_v59  ;;  %2143 = vmatprep.subr.bf16.mxu0 %v3565_v60  ;;  %v3619_v59 = vld [vmem:[#allocation8 + $0x54c] ss:$16 sps:$4 sm:$0xff]   ;;  %v3710_v60 = vld [vmem:[#allocation9 + $0x90] ss:$8 sps:$4 sm:$0xff]  }
 0x1a9   :  { %2230 = vmatpush1.bf16.msra.mxu1 %v3566_v62  ;;  %2144 = vmatpush1.bf16.msra.mxu0 %v3563_v63  ;;  %v3617_v62 = vld [vmem:[#allocation8 + $0x548] ss:$16 sps:$4 sm:$0xff]   ;;  %v3715_v63 = vld [vmem:[#allocation9 + $0xa4] ss:$8 sps:$4 sm:$0xff]  }
 0x1aa   :  { %2231 = vmatprep.subr.bf16.mxu1 %v3574_v0  ;;  %2145 = vmatprep.subr.bf16.mxu0 %v3571_v2  ;;  %v3622_v0 = vld [vmem:[#allocation8 + $0x56c] ss:$16 sps:$4 sm:$0xff]   ;;  %v3713_v2 = vld [vmem:[#allocation9 + $0xa0] ss:$8 sps:$4 sm:$0xff]  }
 0x1ad   :  { %2232 = vmatpush1.bf16.msra.mxu1 %v3572_v4  ;;  %2146 = vmatpush1.bf16.msra.mxu0 %v3569_v5  ;;  %v3620_v4 = vld [vmem:[#allocation8 + $0x568] ss:$16 sps:$4 sm:$0xff]   ;;  %v3718_v5 = vld [vmem:[#allocation9 + $0xb4] ss:$8 sps:$4 sm:$0xff]  }
 0x1ae   :  { %2233 = vmatprep.subr.bf16.mxu1 %v3580_v6  ;;  %2147 = vmatprep.subr.bf16.mxu0 %v3577_v7  ;;  %v3625_v6 = vld [vmem:[#allocation8 + $0x58c] ss:$16 sps:$4 sm:$0xff]   ;;  %v3716_v7 = vld [vmem:[#allocation9 + $0xb0] ss:$8 sps:$4 sm:$0xff]  }
 0x1b1   :  { %2234 = vmatpush1.bf16.msra.mxu1 %v3578_v8  ;;  %2148 = vmatpush1.bf16.msra.mxu0 %v3575_v9  ;;  %v3623_v8 = vld [vmem:[#allocation8 + $0x588] ss:$16 sps:$4 sm:$0xff]   ;;  %v3721_v9 = vld [vmem:[#allocation9 + $0xc4] ss:$8 sps:$4 sm:$0xff]  }
 0x1b2   :  { %2235 = vmatprep.subr.bf16.mxu1 %v3586_v10  ;;  %2149 = vmatprep.subr.bf16.mxu0 %v3583_v11  ;;  %v3628_v10 = vld [vmem:[#allocation8 + $0x5ac] ss:$16 sps:$4 sm:$0xff]   ;;  %v3719_v11 = vld [vmem:[#allocation9 + $0xc0] ss:$8 sps:$4 sm:$0xff]  }
 0x1b5   :  { %2236 = vmatpush1.bf16.msra.mxu1 %v3584_v12  ;;  %2150 = vmatpush1.bf16.msra.mxu0 %v3581_v13  ;;  %v3626_v12 = vld [vmem:[#allocation8 + $0x5a8] ss:$16 sps:$4 sm:$0xff]   ;;  %v3724_v13 = vld [vmem:[#allocation9 + $0xd4] ss:$8 sps:$4 sm:$0xff]  }
 0x1b6   :  { %2248 = vmatprep.subr.bf16.mxu1 %v3589_v14  ;;  %2742 = vmatprep.subr.bf16.mxu0 %v3685_v19  ;;  %v3631_v14 = vld [vmem:[#allocation8 + $0x5cc] ss:$16 sps:$4 sm:$0xff]   ;;  %v3632_v19 = vld [vmem:[#allocation8 + $0x5e8] ss:$16 sps:$4 sm:$0xff]  }
 0x1b8   :  { %2238 = vmatmul.mubr.bf16.vlgmr.msra.gmra.mrb[12].mxu1 %v4046_v18  ;;  %2152 = vmatmul.mubr.bf16.vlgmr.msra.gmra.mrb[8].mxu0 %v4057_v1  ;;  %v3598_v18 = vld [vmem:[#allocation8 + $0x46c] ss:$16 sps:$4 sm:$0xff]  }
 0x1b9   :  { %2249 = vmatpush1.bf16.msra.mxu1 %v3587_v15  ;;  %2280 = vmatprep.mubr.bf16.mxu1 %v4055_v61  ;;  %v3692_v61 = vld [vmem:[#allocation9 + $0x30] ss:$8 sps:$4 sm:$0xff]  }
 0x1ba   :  { %2250 = vmatprep.subr.bf16.mxu1 %v3592_v16  ;;  %2743 = vmatpush1.bf16.msra.mxu0 %v3683_v17  ;;  %v3722_v15 = vld [vmem:[#allocation9 + $0xd0] ss:$8 sps:$4 sm:$0xff]   ;;  %v3634_v17 = vld [vmem:[#allocation8 + $0x5ec] ss:$16 sps:$4 sm:$0xff]  }
 0x1bb   :  { %2744 = vmatprep.subr.bf16.mxu0 %v3688_v20  ;;  %v3629_v16 = vld [vmem:[#allocation8 + $0x5c8] ss:$16 sps:$4 sm:$0xff]  }
 0x1bc   :  { %v3635_v20 = vld [vmem:[#allocation8 + $0x608] ss:$16 sps:$4 sm:$0xff]  }
 0x1bd   :  { %2251 = vmatpush1.bf16.msra.mxu1 %v3590_v23  ;;  %v3637_v23 = vld [vmem:[#allocation8 + $0x60c] ss:$16 sps:$4 sm:$0xff]  }
 0x1be   :  { %2252 = vmatprep.subr.bf16.mxu1 %v3595_v21  ;;  %2745 = vmatpush1.bf16.msra.mxu0 %v3686_v22  ;;  %v3640_v21 = vld [vmem:[#allocation8 + $0x62c] ss:$16 sps:$4 sm:$0xff]   ;;  %v3638_v22 = vld [vmem:[#allocation8 + $0x628] ss:$16 sps:$4 sm:$0xff]  }
 0x1bf   :  { %2746 = vmatprep.subr.bf16.mxu0 %v3691_v25  ;;  %v3641_v25 = vld [vmem:[#allocation8 + $0x648] ss:$16 sps:$4 sm:$0xff]  }
 0x1c1   :  { %2253 = vmatpush1.bf16.msra.mxu1 %v3593_v24  ;;  %v3643_v24 = vld [vmem:[#allocation8 + $0x64c] ss:$16 sps:$4 sm:$0xff]  }
 0x1c2   :  { %2254 = vmatprep.subr.bf16.mxu1 %v3598_v18  ;;  %2747 = vmatpush1.bf16.msra.mxu0 %v3689_v26  ;;  %v3646_v18 = vld [vmem:[#allocation8 + $0x66c] ss:$16 sps:$4 sm:$0xff]   ;;  %v3644_v26 = vld [vmem:[#allocation8 + $0x668] ss:$16 sps:$4 sm:$0xff]  }
 0x1c3   :  { %2748 = vmatprep.subr.bf16.mxu0 %v3694_v28  ;;  %v3647_v28 = vld [vmem:[#allocation8 + $0x688] ss:$16 sps:$4 sm:$0xff]  }
 0x1c5   :  { %2255 = vmatpush1.bf16.msra.mxu1 %v3596_v27  ;;  %v3649_v27 = vld [vmem:[#allocation8 + $0x68c] ss:$16 sps:$4 sm:$0xff]  }
 0x1c6   :  { %2256 = vmatprep.subr.bf16.mxu1 %v3601_v29  ;;  %2749 = vmatpush1.bf16.msra.mxu0 %v3692_v61  ;;  %v3652_v29 = vld [vmem:[#allocation8 + $0x6ac] ss:$16 sps:$4 sm:$0xff]  }
 0x1c7   :  { %2750 = vmatprep.subr.bf16.mxu0 %v3697_v31  ;;  %v3655_v61 = vld [vmem:[#allocation8 + $0x6cc] ss:$16 sps:$4 sm:$0xff]  }
 0x1c9   :  { %2257 = vmatpush1.bf16.msra.mxu1 %v3599_v30 }
 0x1ca   :  { %2258 = vmatprep.subr.bf16.mxu1 %v3604_v32  ;;  %2751 = vmatpush1.bf16.msra.mxu0 %v3695_v33  ;;  %v3653_v32 = vld [vmem:[#allocation8 + $0x6c8] ss:$16 sps:$4 sm:$0xff]   ;;  %v3727_v33 = vld [vmem:[#allocation9 + $0xe4] ss:$8 sps:$4 sm:$0xff]  }
 0x1cb   :  { %2752 = vmatprep.subr.bf16.mxu0 %v3700_v35  ;;  %v3658_v35 = vld [vmem:[#allocation8 + $0x6ec] ss:$16 sps:$4 sm:$0xff]  }
 0x1cd   :  { %2259 = vmatpush1.bf16.msra.mxu1 %v3602_v34 }
 0x1ce   :  { %2260 = vmatprep.subr.bf16.mxu1 %v3607_v36  ;;  %2753 = vmatpush1.bf16.msra.mxu0 %v3698_v37  ;;  %v3725_v36 = vld [vmem:[#allocation9 + $0xe0] ss:$8 sps:$4 sm:$0xff]  }
 0x1cf   :  { %2754 = vmatprep.subr.bf16.mxu0 %v3703_v42  ;;  %v3656_v37 = vld [vmem:[#allocation8 + $0x6e8] ss:$16 sps:$4 sm:$0xff]   ;;  %v3661_v42 = vld [vmem:[#allocation8 + $0x70c] ss:$16 sps:$4 sm:$0xff]  }
 0x1d1   :  { %2261 = vmatpush1.bf16.msra.mxu1 %v3605_v38  ;;  %v3730_v38 = vld [vmem:[#allocation9 + $0xf4] ss:$8 sps:$4 sm:$0xff]  }
 0x1d2   :  { %2262 = vmatprep.subr.bf16.mxu1 %v3610_v46  ;;  %2755 = vmatpush1.bf16.msra.mxu0 %v3701_v47  ;;  %v3728_v46 = vld [vmem:[#allocation9 + $0xf0] ss:$8 sps:$4 sm:$0xff]  }
 0x1d3   :  { %2756 = vmatprep.subr.bf16.mxu0 %v3706_v49  ;;  %v3659_v47 = vld [vmem:[#allocation8 + $0x708] ss:$16 sps:$4 sm:$0xff]   ;;  %v3733_v49 = vld [vmem:[#allocation9 + $0x104] ss:$8 sps:$4 sm:$0xff]  }
 0x1d5   :  { %2263 = vmatpush1.bf16.msra.mxu1 %v3608_v48  ;;  %v3664_v48 = vld [vmem:[#allocation8 + $0x72c] ss:$16 sps:$4 sm:$0xff]  }
 0x1d6   :  { %2264 = vmatprep.subr.bf16.mxu1 %v3613_v50  ;;  %2757 = vmatpush1.bf16.msra.mxu0 %v3704_v51  ;;  %v3662_v50 = vld [vmem:[#allocation8 + $0x728] ss:$16 sps:$4 sm:$0xff]   ;;  %v3667_v51 = vld [vmem:[#allocation8 + $0x74c] ss:$16 sps:$4 sm:$0xff]  }
 0x1d7   :  { %2758 = vmatprep.subr.bf16.mxu0 %v3709_v53  ;;  %v3670_v53 = vld [vmem:[#allocation8 + $0x76c] ss:$16 sps:$4 sm:$0xff]  }
 0x1d9   :  { %2265 = vmatpush1.bf16.msra.mxu1 %v3611_v52  ;;  %v3665_v52 = vld [vmem:[#allocation8 + $0x748] ss:$16 sps:$4 sm:$0xff]  }
 0x1da   :  { %2266 = vmatprep.subr.bf16.mxu1 %v3616_v54  ;;  %2759 = vmatpush1.bf16.msra.mxu0 %v3707_v55  ;;  %v3668_v54 = vld [vmem:[#allocation8 + $0x768] ss:$16 sps:$4 sm:$0xff]   ;;  %v3673_v55 = vld [vmem:[#allocation8 + $0x78c] ss:$16 sps:$4 sm:$0xff]  }
 0x1db   :  { %2760 = vmatprep.subr.bf16.mxu0 %v3712_v57  ;;  %v3676_v57 = vld [vmem:[#allocation8 + $0x7ac] ss:$16 sps:$4 sm:$0xff]  }
 0x1dd   :  { %2267 = vmatpush1.bf16.msra.mxu1 %v3614_v56  ;;  %v3671_v56 = vld [vmem:[#allocation8 + $0x788] ss:$16 sps:$4 sm:$0xff]  }
 0x1de   :  { %2268 = vmatprep.subr.bf16.mxu1 %v3619_v59  ;;  %2761 = vmatpush1.bf16.msra.mxu0 %v3710_v60  ;;  %v3674_v59 = vld [vmem:[#allocation8 + $0x7a8] ss:$16 sps:$4 sm:$0xff]   ;;  %v3679_v60 = vld [vmem:[#allocation8 + $0x7cc] ss:$16 sps:$4 sm:$0xff]  }
 0x1df   :  { %2762 = vmatprep.subr.bf16.mxu0 %v3715_v63  ;;  %v3682_v63 = vld [vmem:[#allocation8 + $0x7ec] ss:$16 sps:$4 sm:$0xff]  }
 0x1e1   :  { %2269 = vmatpush1.bf16.msra.mxu1 %v3617_v62  ;;  %v3677_v62 = vld [vmem:[#allocation8 + $0x7c8] ss:$16 sps:$4 sm:$0xff]  }
 0x1e2   :  { %2270 = vmatprep.subr.bf16.mxu1 %v3622_v0  ;;  %2763 = vmatpush1.bf16.msra.mxu0 %v3713_v2  ;;  %v3680_v0 = vld [vmem:[#allocation8 + $0x7e8] ss:$16 sps:$4 sm:$0xff]   ;;  %v4075_v2 = vld [vmem:[%s4116_s4] sm:$0xf] }
 0x1e3   :  { %2764 = vmatprep.subr.bf16.mxu0 %v3718_v5  ;;  %v697_v5 = vrot.slane %v4075_v2, %v4031_v44 }
 0x1e5   :  { %2271 = vmatpush1.bf16.msra.mxu1 %v3620_v4  ;;  %v693_v4 = vrot.slane %v4075_v2, %v4024_v41 }
 0x1e6   :  { %2272 = vmatprep.subr.bf16.mxu1 %v3625_v6  ;;  %2765 = vmatpush1.bf16.msra.mxu0 %v3716_v7 }
 0x1e7   :  { %2766 = vmatprep.subr.bf16.mxu0 %v3721_v9 }
 0x1e9   :  { %2273 = vmatpush1.bf16.msra.mxu1 %v3623_v8 }
 0x1ea   :  { %2274 = vmatprep.subr.bf16.mxu1 %v3628_v10  ;;  %2767 = vmatpush1.bf16.msra.mxu0 %v3719_v11 }
 0x1eb   :  { %2768 = vmatprep.subr.bf16.mxu0 %v3724_v13 }
 0x1ed   :  { %2275 = vmatpush1.bf16.msra.mxu1 %v3626_v12 }
 0x1ee   :  { %2276 = vmatprep.subr.bf16.mxu1 %v3631_v14  ;;  %2769 = vmatpush1.bf16.msra.mxu0 %v3722_v15 }
 0x1ef   :  { %2770 = vmatprep.subr.bf16.mxu0 %v3727_v33  ;;  %v3754_v33 = vld [vmem:[#allocation9 + $0x174] ss:$8 sps:$4 sm:$0xff]  }
 0x1f1   :  { %2277 = vmatpush1.bf16.msra.mxu1 %v3629_v16 }
 0x1f2   :  { %2278 = vmatprep.subr.bf16.mxu1 %v3634_v17  ;;  %2771 = vmatpush1.bf16.msra.mxu0 %v3725_v36  ;;  %v3755_v36 = vld [vmem:[#allocation9 + $0x180] ss:$8 sps:$4 sm:$0xff]  }
 0x1f3   :  { %2772 = vmatprep.subr.bf16.mxu0 %v3730_v38  ;;  %v3758_v38 = vld [vmem:[#allocation9 + $0x190] ss:$8 sps:$4 sm:$0xff]  }
 0x1f5   :  { %2279 = vmatpush1.bf16.msra.mxu1 %v3632_v19 }
 0x1f6   :  { %2291 = vmatprep.subr.bf16.mxu1 %v3637_v23  ;;  %2773 = vmatpush1.bf16.msra.mxu0 %v3728_v46  ;;  %v3761_v46 = vld [vmem:[#allocation9 + $0x1a0] ss:$8 sps:$4 sm:$0xff]  }
 0x1f7   :  { %2785 = vmatprep.subr.bf16.mxu0 %v3733_v49  ;;  %v3769_v49 = vld [vmem:[#allocation9 + $0x1c4] ss:$8 sps:$4 sm:$0xff]  }
 0x1f8   :  { %2281 = vmatmul.mubr.bf16.vlgmr.msra.gmra.mrb[12].mxu1 %v4053_v58  ;;  %v3650_v58 = vld [vmem:[#allocation8 + $0x6a8] ss:$16 sps:$4 sm:$0xff]  }
 0x1f9   :  { %2292 = vmatpush1.bf16.msra.mxu1 %v3635_v20  ;;  %2323 = vmatprep.mubr.bf16.mxu1 %v4060_v3 }
 0x1fa   :  { %2293 = vmatprep.subr.bf16.mxu1 %v3640_v21 }
 0x1fd   :  { %2294 = vmatpush1.bf16.msra.mxu1 %v3638_v22 }
 0x1fe   :  { %2295 = vmatprep.subr.bf16.mxu1 %v3643_v24  ;;  %v3731_v24 = vld [vmem:[#allocation9 + $0x100] ss:$8 sps:$4 sm:$0xff]  }
 0x201   :  { %2296 = vmatpush1.bf16.msra.mxu1 %v3641_v25  ;;  %v3736_v25 = vld [vmem:[#allocation9 + $0x114] ss:$8 sps:$4 sm:$0xff]  }
 0x202   :  { %2297 = vmatprep.subr.bf16.mxu1 %v3646_v18  ;;  %v3734_v18 = vld [vmem:[#allocation9 + $0x110] ss:$8 sps:$4 sm:$0xff]  }
 0x205   :  { %2298 = vmatpush1.bf16.msra.mxu1 %v3644_v26  ;;  %v3739_v26 = vld [vmem:[#allocation9 + $0x124] ss:$8 sps:$4 sm:$0xff]  }
 0x206   :  { %2299 = vmatprep.subr.bf16.mxu1 %v3649_v27  ;;  %v3737_v27 = vld [vmem:[#allocation9 + $0x120] ss:$8 sps:$4 sm:$0xff]  }
 0x209   :  { %2300 = vmatpush1.bf16.msra.mxu1 %v3647_v28  ;;  %v3742_v28 = vld [vmem:[#allocation9 + $0x134] ss:$8 sps:$4 sm:$0xff]  }
 0x20a   :  { %2301 = vmatprep.subr.bf16.mxu1 %v3652_v29  ;;  %v3740_v29 = vld [vmem:[#allocation9 + $0x130] ss:$8 sps:$4 sm:$0xff]  }
 0x20b   :  { %v2024_v3 = vpop.f32.mrb[8].mxu1 }
 0x20c   :  { %v2026_v30 = vpop.f32.mrb[9].mxu1  ;;  %v2025_v6 = vadd.f32 %v2024_v3, %v693_v4  ;;  %v3748_v3 = vld [vmem:[#allocation9 + $0x154] ss:$8 sps:$4 sm:$0xff]  }
 0x20d   :  { %2302 = vmatpush1.bf16.msra.mxu1 %v3650_v58  ;;  %v2028_v31 = vpop.f32.mrb[10].mxu1  ;;  %v2027_v7 = vadd.f32 %v2026_v30, %v697_v5  ;;  %v3745_v58 = vld [vmem:[#allocation9 + $0x144] ss:$8 sps:$4 sm:$0xff]   ;;  %v3746_v30 = vld [vmem:[#allocation9 + $0x150] ss:$8 sps:$4 sm:$0xff]  }
 0x20e   :  { %v2030_v34 = vpop.f32.mrb[11].mxu1  ;;  %2303 = vmatprep.subr.bf16.mxu1 %v3655_v61  ;;  %v2029_v9 = vadd.f32 %v2028_v31, %v693_v4  ;;  %v3743_v61 = vld [vmem:[#allocation9 + $0x140] ss:$8 sps:$4 sm:$0xff]   ;;  %v3751_v31 = vld [vmem:[#allocation9 + $0x164] ss:$8 sps:$4 sm:$0xff]  }
 0x20f   :  { %v2031_v12 = vadd.f32 %v2030_v34, %v697_v5  ;;  %v3752_v34 = vld [vmem:[#allocation9 + $0x170] ss:$8 sps:$4 sm:$0xff]  }
 0x211   :  { %2304 = vmatpush1.bf16.msra.mxu1 %v3653_v32  ;;  %v3749_v32 = vld [vmem:[#allocation9 + $0x160] ss:$8 sps:$4 sm:$0xff]  }
 0x212   :  { %2305 = vmatprep.subr.bf16.mxu1 %v3658_v35  ;;  %v3757_v35 = vld [vmem:[#allocation9 + $0x184] ss:$8 sps:$4 sm:$0xff]  }
 0x215   :  { %2306 = vmatpush1.bf16.msra.mxu1 %v3656_v37  ;;  %v3760_v37 = vld [vmem:[#allocation9 + $0x194] ss:$8 sps:$4 sm:$0xff]  }
 0x216   :  { %2307 = vmatprep.subr.bf16.mxu1 %v3661_v42  ;;  %v3763_v42 = vld [vmem:[#allocation9 + $0x1a4] ss:$8 sps:$4 sm:$0xff]  }
 0x219   :  { %2308 = vmatpush1.bf16.msra.mxu1 %v3659_v47  ;;  %v3766_v47 = vld [vmem:[#allocation9 + $0x1b4] ss:$8 sps:$4 sm:$0xff]  }
 0x21a   :  { %2309 = vmatprep.subr.bf16.mxu1 %v3664_v48  ;;  %v3764_v48 = vld [vmem:[#allocation9 + $0x1b0] ss:$8 sps:$4 sm:$0xff]  }
 0x21d   :  { %2310 = vmatpush1.bf16.msra.mxu1 %v3662_v50  ;;  %v3767_v50 = vld [vmem:[#allocation9 + $0x1c0] ss:$8 sps:$4 sm:$0xff]  }
 0x21e   :  { %2311 = vmatprep.subr.bf16.mxu1 %v3667_v51  ;;  %v3772_v51 = vld [vmem:[#allocation9 + $0x1d4] ss:$8 sps:$4 sm:$0xff]  }
 0x221   :  { %2312 = vmatpush1.bf16.msra.mxu1 %v3665_v52  ;;  %v3770_v52 = vld [vmem:[#allocation9 + $0x1d0] ss:$8 sps:$4 sm:$0xff]  }
 0x222   :  { %2313 = vmatprep.subr.bf16.mxu1 %v3670_v53  ;;  %v3775_v53 = vld [vmem:[#allocation9 + $0x1e4] ss:$8 sps:$4 sm:$0xff]  }
 0x225   :  { %2314 = vmatpush1.bf16.msra.mxu1 %v3668_v54  ;;  %v3773_v54 = vld [vmem:[#allocation9 + $0x1e0] ss:$8 sps:$4 sm:$0xff]  }
 0x226   :  { %2315 = vmatprep.subr.bf16.mxu1 %v3673_v55  ;;  %v3778_v55 = vld [vmem:[#allocation9 + $0x1f4] ss:$8 sps:$4 sm:$0xff]  }
 0x229   :  { %2316 = vmatpush1.bf16.msra.mxu1 %v3671_v56  ;;  %v3776_v56 = vld [vmem:[#allocation9 + $0x1f0] ss:$8 sps:$4 sm:$0xff]  }
 0x22a   :  { %2317 = vmatprep.subr.bf16.mxu1 %v3676_v57  ;;  %v701_v57 = vrot.slane %v4075_v2, %v122_v43  ;;  %v2410_v43 = vld [vmem:[%s4118_s6] sm:$0x3]  ;;  %s3908_s6 = smov [#allocation11]  }
 0x22d   :  { %2318 = vmatpush1.bf16.msra.mxu1 %v3674_v59  ;;  %v705_v59 = vrot.slane %v4075_v2, %v126_v45  ;;  %v2415_v45 = vrot.slane %v2410_v43, %v4024_v41  ;;  %v2419_v2 = vrot.slane %v2410_v43, %v4031_v44 }
 0x22e   :  { %2319 = vmatprep.subr.bf16.mxu1 %v3679_v60 }
 0x231   :  { %2320 = vmatpush1.bf16.msra.mxu1 %v3677_v62 }
 0x232   :  { %2321 = vmatprep.subr.bf16.mxu1 %v3682_v63 }
 0x235   :  { %2322 = vmatpush1.bf16.msra.mxu1 %v3680_v0 }
 0x238   :  { %2324 = vmatmul.mubr.bf16.vlgmr.msra.gmra.mrb[12].mxu1 %v4057_v1 }
 0x28b   :  { %v2153_v8 = vpop.f32.mrb[8].mxu0 }
 0x28c   :  { %v3246_v10 = vadd.f32 %v2153_v8, %v2025_v6  ;;  %v2155_v11 = vpop.f32.mrb[9].mxu0 }
 0x28d   :  { %v3248_v13 = vadd.f32 %v2155_v11, %v2027_v7  ;;  %v2157_v1 = vpop.f32.mrb[10].mxu0 }
 0x28e   :  { %v3250_v14 = vadd.f32 %v2157_v1, %v2029_v9  ;;  %v2159_v15 = vpop.f32.mrb[11].mxu0  ;;  %v2334_v17 = vmax.f32 %v3246_v10, 0.0  ;;  %v2832_v1 = vld [vmem:[%s4119_s7] sm:$0x3]  ;;  %s2893_s7 = sshll.u32 %s3908_s6, 4  ;;  %s2894_s7 = int_to_ptr.vmem [resolvable:$true] %s2893_s7 }
 0x28f   :  { %v3252_v16 = vadd.f32 %v2159_v15, %v2031_v12  ;;  %v2335_v23 = vmax.f32 %v3248_v13, 0.0  ;;  %s3867_s21 = scalar_lea.vmem %s2894_s7, 16  ;;  %s3871_s22 = scalar_lea.vmem %s2894_s7, 32 }
 0x290   :  { %v2338_v19 = vmax.f32 %v3250_v14, 0.0  ;;  %p3868_p4 = scmp.ne.s32.totalorder %s2894_s7, %s3867_s21  ;;  %p3872_p5 = scmp.lt.s32.totalorder %s2894_s7, %s2894_s7 }
 0x291   :  { %v2339_v20 = vmax.f32 %v3252_v16, 0.0  ;;  %p3873_p6 = scmp.lt.s32.totalorder %s3871_s22, %s3867_s21 }
 0x292   :  { %v2342_v21 = vpack.c.bf16 %v2338_v19, %v2334_v17  ;;  %v2837_v17 = vrot.slane %v2832_v1, %v4024_v41  ;;  %v3244_v41 = vld [vmem:[#allocation2] ss:$0 sm:$0xff] }
 0x293   :  { %v2343_v22 = vpack.c.bf16 %v2339_v20, %v2335_v23  ;;  %v2841_v20 = vrot.slane %v2832_v1, %v4031_v44  ;;  %p3874_p7 = por %p3873_p6, %p3872_p5 }
 0x295   :  { %2774 = vmatprep.mubr.bf16.mxu0 %v2343_v22  ;;  %p3875_p8 = pnand %p3874_p7, %p3868_p4 }
 0x296   :  { %2775 = vmatmul.mubr.bf16.vlgmr.msra.gmra.mrb[12].mxu0 %v2342_v21 }
 0x297   :  { %2786 = vmatpush1.bf16.msra.mxu0 %v3731_v24 }
 0x298   :  { %2787 = vmatprep.subr.bf16.mxu0 %v3736_v25 }
 0x29b   :  { %2788 = vmatpush1.bf16.msra.mxu0 %v3734_v18 }
 0x29c   :  { %2789 = vmatprep.subr.bf16.mxu0 %v3739_v26 }
 0x29f   :  { %2790 = vmatpush1.bf16.msra.mxu0 %v3737_v27 }
 0x2a0   :  { %2791 = vmatprep.subr.bf16.mxu0 %v3742_v28 }
 0x2a3   :  { %2792 = vmatpush1.bf16.msra.mxu0 %v3740_v29 }
 0x2a4   :  { %2793 = vmatprep.subr.bf16.mxu0 %v3745_v58 }
 0x2a7   :  { %2794 = vmatpush1.bf16.msra.mxu0 %v3743_v61 }
 0x2a8   :  { %2795 = vmatprep.subr.bf16.mxu0 %v3748_v3 }
 0x2ab   :  { %2796 = vmatpush1.bf16.msra.mxu0 %v3746_v30 }
 0x2ac   :  { %2797 = vmatprep.subr.bf16.mxu0 %v3751_v31 }
 0x2af   :  { %2798 = vmatpush1.bf16.msra.mxu0 %v3749_v32 }
 0x2b0   :  { %2799 = vmatprep.subr.bf16.mxu0 %v3754_v33 }
 0x2b3   :  { %2800 = vmatpush1.bf16.msra.mxu0 %v3752_v34  ;;  %v2872_v34 = vand.u32 127, %v112_v39 }
 0x2b4   :  { %2801 = vmatprep.subr.bf16.mxu0 %v3757_v35 }
 0x2b5   :  { %v2877_v35 = vadd.s32 4294967288, %v2872_v34 }
 0x2b7   :  { %2802 = vmatpush1.bf16.msra.mxu0 %v3755_v36 }
 0x2b8   :  { %2803 = vmatprep.subr.bf16.mxu0 %v3760_v37  ;;  %v2875_v37 = vsub.s32 %v2872_v34, %v4021_v40 }
 0x2bb   :  { %2804 = vmatpush1.bf16.msra.mxu0 %v3758_v38  ;;  %v2880_v38 = vsub.s32 %v2877_v35, %v4021_v40 }
 0x2bc   :  { %2805 = vmatprep.subr.bf16.mxu0 %v3763_v42 }
 0x2bf   :  { %2806 = vmatpush1.bf16.msra.mxu0 %v3761_v46 }
 0x2c0   :  { %2807 = vmatprep.subr.bf16.mxu0 %v3766_v47 }
 0x2c3   :  { %2808 = vmatpush1.bf16.msra.mxu0 %v3764_v48 }
 0x2c4   :  { %2809 = vmatprep.subr.bf16.mxu0 %v3769_v49 }
 0x2c7   :  { %2810 = vmatpush1.bf16.msra.mxu0 %v3767_v50 }
 0x2c8   :  { %2811 = vmatprep.subr.bf16.mxu0 %v3772_v51 }
 0x2cb   :  { %2812 = vmatpush1.bf16.msra.mxu0 %v3770_v52 }
 0x2cc   :  { %2813 = vmatprep.subr.bf16.mxu0 %v3775_v53 }
 0x2cf   :  { %2814 = vmatpush1.bf16.msra.mxu0 %v3773_v54 }
 0x2d0   :  { %2815 = vmatprep.subr.bf16.mxu0 %v3778_v55 }
 0x2d3   :  { %2816 = vmatpush1.bf16.msra.mxu0 %v3776_v56 }
 0x30b   :  { %v2325_v60 = vpop.f32.mrb[12].mxu1 }
 0x30c   :  { %v3253_v62 = vadd.f32 %v2325_v60, %v701_v57  ;;  %v2327_v63 = vpop.f32.mrb[13].mxu1 }
 0x30d   :  { %v3254_v0 = vadd.f32 %v2327_v63, %v705_v59  ;;  %v2329_v4 = vpop.f32.mrb[14].mxu1 }
 0x30e   :  { %v3255_v5 = vadd.f32 %v2329_v4, %v701_v57  ;;  %v2331_v6 = vpop.f32.mrb[15].mxu1  ;;  %v2336_v8 = vmax.f32 %v3253_v62, 0.0 }
 0x30f   :  { %v3256_v7 = vadd.f32 %v2331_v6, %v705_v59  ;;  %v2337_v10 = vmax.f32 %v3254_v0, 0.0 }
 0x310   :  { %v2340_v9 = vmax.f32 %v3255_v5, 0.0 }
 0x311   :  { %v2341_v11 = vmax.f32 %v3256_v7, 0.0 }
 0x312   :  { %v2344_v12 = vpack.c.bf16 %v2340_v9, %v2336_v8 }
 0x313   :  { %v2345_v13 = vpack.c.bf16 %v2341_v11, %v2337_v10 }
 0x315   :  { %2817 = vmatprep.mubr.bf16.mxu0 %v2345_v13 }
 0x316   :  { %2818 = vmatmul.mubr.bf16.vlgmr.msra.gmra.mrb[12].mxu0 %v2344_v12 }
 0x3e9   :  { %v2819_v14 = vpop.f32.mrb[12].mxu0 }
 0x3ea   :  { %v3257_v15 = vadd.f32 %v2819_v14, %v2415_v45  ;;  %v2821_v16 = vpop.f32.mrb[13].mxu0 }
 0x3eb   :  { %v3258_v19 = vadd.f32 %v2821_v16, %v2419_v2  ;;  %v2823_v23 = vpop.f32.mrb[14].mxu0 }
 0x3ec   :  { %v2828_v21 = vmax.f32 %v3257_v15, 0.0  ;;  %v3259_v22 = vadd.f32 %v2823_v23, %v2415_v45  ;;  %v2825_v24 = vpop.f32.mrb[15].mxu0 }
 0x3ed   :  { %v2829_v25 = vmax.f32 %v3258_v19, 0.0  ;;  %v3260_v18 = vadd.f32 %v2825_v24, %v2419_v2 }
 0x3ee   :  { %v2830_v26 = vmax.f32 %v3259_v22, 0.0  ;;  %v2844_v27 = vmul.f32 %v2837_v17, %v2828_v21 }
 0x3ef   :  { %v2831_v28 = vmax.f32 %v3260_v18, 0.0  ;;  %v2845_v29 = vmul.f32 %v2841_v20, %v2829_v25 }
 0x3f0   :  { %v2846_v58 = vmul.f32 %v2837_v17, %v2830_v26 }
 0x3f1   :  { %v2847_v61 = vmul.f32 %v2841_v20, %v2831_v28  ;;  %v2848_v3 = vadd.f32 %v2845_v29, %v2844_v27 }
 0x3f3   :  { %2849 = vadd.xlane.f32.xlu0 %v2848_v3  ;;  %v2851_v30 = vadd.f32 %v2847_v61, %v2846_v58 }
 0x3f7   :  { %2852 = vadd.xlane.f32.xlu0 %v2851_v30 }
 0x480   :  { %v2850_v31 = vpop.xlane.xlu0 %2849 }
 0x481   :  { %v2861_v32 = vadd.f32 %v3244_v41, %v2850_v31 }
 0x483   :  { %2866 = vperm.xlu1 %3297, %v2861_v32  }
 0x484   :  { %v2853_v44 = vpop.xlane.xlu0 %2852 }
 0x485   :  { %v2862_v33 = vadd.f32 %v3244_v41, %v2853_v44 }
 0x487   :  { %2869 = vperm.xlu1 %3297, %v2862_v33  }
 0x502   :  { %v2867_v36 = vpop.permute.xlu1 %2866 }
 0x503   :  { %v2876_v46 = vrot.slane %v2867_v36, %v2875_v37 }
 0x506   :  { %v2870_v42 = vpop.permute.xlu1 %2869 }
 0x507   :  { %v2881_v47 = vrot.slane %v2870_v42, %v2880_v38 }
 0x509   :  { %v2883_v48 = vsel %vm2882_vm1, %v2881_v47, %v2876_v46 }
 0x50a   :  { %2886 = vst.msk [vmem:[#allocation11] sm:$0x1] %vm2885_vm2, %v2883_v48 }
 0x50b   :  { %3878 = shalt.err (!%p3875_p8)
}
 0x50c   :  { %s3879_s0 = scalar_lea.hbm %s4121_s9, 16 }
 0x50d   :  { %p3880_p9 = scmp.ne.s32.totalorder %s4121_s9, %s3879_s0  ;;  %p3883_p10 = scmp.lt.u32.totalorder %s3879_s0, %s4121_s9 }
 0x50f   :  { %p3885_p11 = pnand %p3883_p10, %p3880_p9 }
 0x511   :  { %3888 = shalt.err (!%p3885_p11)
}
 0x512   :  { %2896 = dma.vmem_to_hbm [thread:$0]  %s2894_s7, 16, %s4121_s9, [#allocation5]  }
 0x513   :  { %3895 = dma.done.wait [#allocation5], 16  }
 0x514   :  { %3896 = vsyncadd [#allocation5], 4294967280 }
 0x515   :  { %2900 = vsyncpa [#allocation4], 1 }
 0x516   :  { %2901 = vsyncpa [#allocation7], 1 }
 0x517   :  { %2902 = vsyncpa [#allocation10], 1 }
 0x518   :  { %2903 = vsyncpa [#allocation5], 1 }

</bundles_post_ra>
